<compile_context>
chip_gen: v7x
topology: tpu7x:2x2x1
jax: 0.10.0
libtpu: 0.0.40
codegen_flags: <defaults>
</compile_context>

<pallas_src>
import functools

import jax
import jax.numpy as jnp
from jax import lax
from jax.experimental import pallas as pl
from jax.experimental.pallas import tpu as pltpu

EPS = 1e-5  # torch.nn.InstanceNorm1d default eps


def _inorm(v):
    # InstanceNorm1d (affine=False): per-channel stats over L, biased variance.
    # Centered value computed once and reused.
    m = jnp.mean(v, axis=-1, keepdims=True)
    c = v - m
    var = jnp.mean(c * c, axis=-1, keepdims=True)
    return c * lax.rsqrt(var + EPS)


def _ffadain_resblock_kernel(x_ref, xid_ref, xpo_ref, wpo_ref, wid_ref,
                             g_ref, bsty_ref, wc_ref, bcv_ref, o_ref,
                             *, C, Bb):
    # x_ref   : (Bb, C,    L) f32   native batch-major activations
    # xid_ref : (Bb, 3,    L) f32
    # xpo_ref : (Bb, 1027, L) f32   dominant HBM stream (read once, f32)
    # wpo_ref : (4C, 1027)    f32   stacked po weights [miu1|sigma1|miu2|sigma2]
    # wid_ref : (4C, 3)       f32   stacked id weights (same row order)
    # g_ref   : (4C, 1)       f32   per-row blend scale [beta1|alpha1|beta2|alpha2]
    # bsty_ref: (4C, 1)       f32   pre-blended projection biases
    # wc_ref  : (2, C, C)     f32   [conv1, conv2]
    # bcv_ref : (2, C, 1)     f32   [conv1 bias, conv2 bias]
    # o_ref   : (Bb, C, L)    f32   written directly in (N, C, L) layout
    wpo = wpo_ref[...]
    wid = wid_ref[...]
    g = g_ref[...]
    bsty = bsty_ref[...]
    w1 = wc_ref[0]
    w2 = wc_ref[1]
    bc1 = bcv_ref[0]
    bc2 = bcv_ref[1]

    # Per-batch-element pipeline: InstanceNorm stats must not mix batch elems.
    # Bb <= 4 by construction, so a static Python loop is fine here.
    for bi in range(Bb):
        xb = x_ref[bi]            # (C, L)
        xid = xid_ref[bi]         # (3, L)
        xpo = xpo_ref[bi]         # (1027, L)

        # Stacked style projections [miu1 | sigma1 | miu2 | sigma2]:
        # one MXU pass over K=1027 (compute hidden behind the x_po DMA) ...
        sp = jnp.dot(wpo, xpo, preferred_element_type=jnp.float32)    # (4C, L)
        # ... and the K=3 identity projection on the VPU (no MXU pass wasted).
        si = (wid[:, 0:1] * xid[0:1, :]
              + wid[:, 1:2] * xid[1:2, :]
              + wid[:, 2:3] * xid[2:3, :])                            # (4C, L)
        # alpha/beta blend + folded projection biases.
        style = g * sp + (1.0 - g) * si + bsty                        # (4C, L)

        miu1 = style[0 * C:1 * C]
        sig1 = style[1 * C:2 * C]
        miu2 = style[2 * C:3 * C]
        sig2 = style[3 * C:4 * C]

        x1 = _inorm(xb) * sig1 + miu1
        x1 = jnp.dot(w1, jnp.maximum(x1, 0.0),
                     preferred_element_type=jnp.float32) + bc1
        x2 = _inorm(x1) * sig2 + miu2
        x2 = jnp.dot(w2, jnp.maximum(x2, 0.0),
                     preferred_element_type=jnp.float32) + bc2
        o_ref[bi] = x1 + x2


def _pick_bb(N, L, Cpo, itemsize=4):
    """Batch elements per grid step: ~1-2 MiB f32 x_po block, and keep the
    grid length >= 2 so v7x megacore has work on both TensorCores."""
    per_elem = Cpo * L * itemsize
    cap = max(1, min(N, (2 * 1024 * 1024) // max(per_elem, 1)))
    best = 1
    for bb in range(1, cap + 1):
        if N % bb != 0:
            continue                      # no padding pass on the big stream
        if bb > 1 and N // bb < 2:
            continue                      # keep >= 2 grid steps (megacore)
        best = bb
    return best


@jax.jit
def ffadain_resblock(x, x_id, x_po, wid, wpo, wc, b, ab):
    """x:(N,C,L) x_id:(N,3,L) x_po:(N,1027,L)
    wid:(4,C,3)    slots [ff1.conv_id1, ff1.conv_id2, ff2.conv_id1, ff2.conv_id2]
    wpo:(4,C,1027) slots [ff1.conv_po1, ff1.conv_po2, ff2.conv_po1, ff2.conv_po2]
    wc:(2,C,C)     [conv1, conv2]
    b:(10,C,1)     [ff1: id1,id2,po1,po2 | ff2: id1,id2,po1,po2 | conv1, conv2]
    ab:(2,2)       [[alpha1, beta1], [alpha2, beta2]]
    """
    N, C, L = x.shape
    Cid = x_id.shape[1]   # 3
    Cpo = x_po.shape[1]   # 1027
    # Lane-dense blocks / unmasked vst; relax only with an L-tiling fallback.
    assert L % 128 == 0, "L must be a multiple of 128"
    Bb = _pick_bb(N, L, Cpo)

    # --- stacked style weights, row order [miu1 | sigma1 | miu2 | sigma2] ---
    wpo_all = wpo.reshape(4 * C, Cpo)                                  # f32
    wid_all = wid.reshape(4 * C, Cid)                                  # f32
    # per-row blend scale: miu rows use beta, sigma rows use alpha
    g4 = jnp.stack([ab[0, 1], ab[0, 0], ab[1, 1], ab[1, 0]])           # (4,)
    scale_po = jnp.repeat(g4, C)[:, None].astype(jnp.float32)          # (4C,1)
    # fold the 8 projection biases into one pre-blended (4C,1) bias (exact)
    b_po_sel = jnp.concatenate([b[2], b[3], b[6], b[7]], axis=0)       # (4C,1)
    b_id_sel = jnp.concatenate([b[0], b[1], b[4], b[5]], axis=0)       # (4C,1)
    b_style = scale_po * b_po_sel + (1.0 - scale_po) * b_id_sel        # (4C,1)
    b_conv = b[8:10]                                                   # (2,C,1)

    kernel = functools.partial(_ffadain_resblock_kernel, C=C, Bb=Bb)

    return pl.pallas_call(
        kernel,
        out_shape=jax.ShapeDtypeStruct((N, C, L), jnp.float32),
        grid=(N // Bb,),
        in_specs=[
            pl.BlockSpec((Bb, C, L), lambda n: (n, 0, 0)),         # x (native)
            pl.BlockSpec((Bb, Cid, L), lambda n: (n, 0, 0)),       # x_id
            pl.BlockSpec((Bb, Cpo, L), lambda n: (n, 0, 0)),       # x_po (f32)
            pl.BlockSpec((4 * C, Cpo), lambda n: (0, 0)),          # stacked po W
            pl.BlockSpec((4 * C, Cid), lambda n: (0, 0)),          # stacked id W
            pl.BlockSpec((4 * C, 1), lambda n: (0, 0)),            # blend scales
            pl.BlockSpec((4 * C, 1), lambda n: (0, 0)),            # blended biases
            pl.BlockSpec((2, C, C), lambda n: (0, 0, 0)),          # conv1/conv2 W
            pl.BlockSpec((2, C, 1), lambda n: (0, 0, 0)),          # conv1/conv2 b
        ],
        out_specs=pl.BlockSpec((Bb, C, L), lambda n: (n, 0, 0)),   # native out
        compiler_params=pltpu.CompilerParams(
            dimension_semantics=("parallel",)),                    # megacore
    )(x, x_id, x_po, wpo_all, wid_all, scale_po, b_style, wc, b_conv)


def reference_forward(x, x_id, x_po, wid, wpo, wc, b, ab):
    """Plain-JAX reference mirroring the PyTorch module (f32 arithmetic)."""
    hp = jax.lax.Precision.HIGHEST

    def pconv(w, inp, bias):
        return jnp.einsum('oc,ncl->nol', w, inp, precision=hp) + bias[None, :, :]

    def inorm(v):
        m = v.mean(-1, keepdims=True)
        var = ((v - m) ** 2).mean(-1, keepdims=True)
        return (v - m) / jnp.sqrt(var + EPS)

    def ffadain(v, ws, bs, a):
        alpha, beta = ab[a, 0], ab[a, 1]
        miu_id = pconv(wid[2 * ws + 0], x_id, b[bs + 0])
        sigma_id = pconv(wid[2 * ws + 1], x_id, b[bs + 1])
        miu_po = pconv(wpo[2 * ws + 0], x_po, b[bs + 2])
        sigma_po = pconv(wpo[2 * ws + 1], x_po, b[bs + 3])
        sigma = alpha * sigma_po + (1 - alpha) * sigma_id
        miu = beta * miu_po + (1 - beta) * miu_id
        return inorm(v) * sigma + miu

    x1 = ffadain(x, 0, 0, 0)
    x1 = pconv(wc[0], jnp.maximum(x1, 0.0), b[8])
    x2 = ffadain(x1, 1, 4, 1)
    x2 = pconv(wc[1], jnp.maximum(x2, 0.0), b[9])
    return x1 + x2


if __name__ == "__main__":
    # FFAdaIN fixes x_id to 3 channels and x_po to 1027 channels; pick C=8,
    # N=4 (=> Bb=2, two grid steps), L=128.
    N, C, L = 4, 8, 128
    CID, CPO = 3, 1027

    key = jax.random.PRNGKey(0)
    ks = jax.random.split(key, 8)

    x = jax.random.normal(ks[0], (N, C, L), jnp.float32)
    x_id = jax.random.normal(ks[1], (N, CID, L), jnp.float32)
    x_po = jax.random.normal(ks[2], (N, CPO, L), jnp.float32)

    # Deterministic synthetic parameters (shapes from the module's __init__).
    wid = 0.2 * jax.random.normal(ks[3], (4, C, CID), jnp.float32)    # Conv1d(3, C, 1) x4
    wpo = 0.05 * jax.random.normal(ks[4], (4, C, CPO), jnp.float32)   # Conv1d(1027, C, 1) x4
    wc = 0.2 * jax.random.normal(ks[5], (2, C, C), jnp.float32)       # Conv1d(C, C, 1) x2
    b = 0.1 * jax.random.normal(ks[6], (10, C, 1), jnp.float32)       # all conv biases
    ab = 0.3 * jax.random.normal(ks[7], (2, 2), jnp.float32)          # [[a1, b1], [a2, b2]]

    out = ffadain_resblock(x, x_id, x_po, wid, wpo, wc, b, ab)
    out = jax.block_until_ready(out)
    assert out.shape == (N, C, L)

    # Correctness: the kernel is f32 end-to-end now (no bf16 cast anywhere),
    # so compare directly against the f32 module-structured reference.
    ref = reference_forward(x, x_id, x_po, wid, wpo, wc, b, ab)
    assert jnp.allclose(out, ref, rtol=2e-3, atol=2e-3), \
        f"max abs err {jnp.max(jnp.abs(out - ref))}"

    print("KERNEL_OK")
</pallas_src>

<mosaic_0001>
module attributes {stable_mosaic.version = 11 : i64} {
  func.func @_ffadain_resblock_kernel(%arg0: i32, %arg1: memref<2x8x128xf32, #tpu.memory_space<vmem>>, %arg2: memref<2x3x128xf32, #tpu.memory_space<vmem>>, %arg3: memref<2x1027x128xf32, #tpu.memory_space<vmem>>, %arg4: memref<32x1027xf32, #tpu.memory_space<vmem>>, %arg5: memref<32x3xf32, #tpu.memory_space<vmem>>, %arg6: memref<32x1xf32, #tpu.memory_space<vmem>>, %arg7: memref<32x1xf32, #tpu.memory_space<vmem>>, %arg8: memref<2x8x8xf32, #tpu.memory_space<vmem>>, %arg9: memref<2x8x1xf32, #tpu.memory_space<vmem>>, %arg10: memref<2x8x128xf32, #tpu.memory_space<vmem>>) attributes {dimension_semantics = [#tpu.dimension_semantics<parallel>], iteration_bounds = array<i64: 2>, scalar_prefetch = 0 : i64, scratch_operands = 0 : i64, tpu.core_type = #tpu.core_type<tc>, window_params = [{transform_indices = @transform_0, window_bounds = array<i64: 2, 8, 128>}, {transform_indices = @transform_1, window_bounds = array<i64: 2, 3, 128>}, {transform_indices = @transform_2, window_bounds = array<i64: 2, 1027, 128>}, {pipeline_mode = #tpu.pipeline_mode<synchronous>, transform_indices = @transform_3, window_bounds = array<i64: 32, 1027>}, {pipeline_mode = #tpu.pipeline_mode<synchronous>, transform_indices = @transform_4, window_bounds = array<i64: 32, 3>}, {pipeline_mode = #tpu.pipeline_mode<synchronous>, transform_indices = @transform_5, window_bounds = array<i64: 32, 1>}, {pipeline_mode = #tpu.pipeline_mode<synchronous>, transform_indices = @transform_6, window_bounds = array<i64: 32, 1>}, {pipeline_mode = #tpu.pipeline_mode<synchronous>, transform_indices = @transform_7, window_bounds = array<i64: 2, 8, 8>}, {pipeline_mode = #tpu.pipeline_mode<synchronous>, transform_indices = @transform_8, window_bounds = array<i64: 2, 8, 1>}, {transform_indices = @transform_9, window_bounds = array<i64: 2, 8, 128>}]} {
    %c0 = arith.constant 0 : index
    %c0_0 = arith.constant 0 : index
    %0 = vector.load %arg4[%c0, %c0_0] : memref<32x1027xf32, #tpu.memory_space<vmem>>, vector<32x1027xf32>
    %c0_1 = arith.constant 0 : index
    %c0_2 = arith.constant 0 : index
    %1 = vector.load %arg5[%c0_1, %c0_2] : memref<32x3xf32, #tpu.memory_space<vmem>>, vector<32x3xf32>
    %c0_3 = arith.constant 0 : index
    %c0_4 = arith.constant 0 : index
    %2 = vector.load %arg6[%c0_3, %c0_4] : memref<32x1xf32, #tpu.memory_space<vmem>>, vector<32x1xf32>
    %c0_5 = arith.constant 0 : index
    %c0_6 = arith.constant 0 : index
    %3 = vector.load %arg7[%c0_5, %c0_6] : memref<32x1xf32, #tpu.memory_space<vmem>>, vector<32x1xf32>
    %c0_7 = arith.constant 0 : index
    %c0_8 = arith.constant 0 : index
    %c0_9 = arith.constant 0 : index
    %4 = vector.load %arg8[%c0_7, %c0_8, %c0_9] : memref<2x8x8xf32, #tpu.memory_space<vmem>>, vector<1x8x8xf32>
    %5 = vector.shape_cast %4 : vector<1x8x8xf32> to vector<8x8xf32>
    %c1 = arith.constant 1 : index
    %c0_10 = arith.constant 0 : index
    %c0_11 = arith.constant 0 : index
    %6 = vector.load %arg8[%c1, %c0_10, %c0_11] : memref<2x8x8xf32, #tpu.memory_space<vmem>>, vector<1x8x8xf32>
    %7 = vector.shape_cast %6 : vector<1x8x8xf32> to vector<8x8xf32>
    %c0_12 = arith.constant 0 : index
    %c0_13 = arith.constant 0 : index
    %c0_14 = arith.constant 0 : index
    %8 = vector.load %arg9[%c0_12, %c0_13, %c0_14] : memref<2x8x1xf32, #tpu.memory_space<vmem>>, vector<1x8x1xf32>
    %9 = vector.shape_cast %8 : vector<1x8x1xf32> to vector<8x1xf32>
    %c1_15 = arith.constant 1 : index
    %c0_16 = arith.constant 0 : index
    %c0_17 = arith.constant 0 : index
    %10 = vector.load %arg9[%c1_15, %c0_16, %c0_17] : memref<2x8x1xf32, #tpu.memory_space<vmem>>, vector<1x8x1xf32>
    %11 = vector.shape_cast %10 : vector<1x8x1xf32> to vector<8x1xf32>
    %c0_18 = arith.constant 0 : index
    %c0_19 = arith.constant 0 : index
    %c0_20 = arith.constant 0 : index
    %12 = vector.load %arg1[%c0_18, %c0_19, %c0_20] : memref<2x8x128xf32, #tpu.memory_space<vmem>>, vector<1x8x128xf32>
    %13 = vector.shape_cast %12 : vector<1x8x128xf32> to vector<8x128xf32>
    %c0_21 = arith.constant 0 : index
    %c0_22 = arith.constant 0 : index
    %c0_23 = arith.constant 0 : index
    %14 = vector.load %arg2[%c0_21, %c0_22, %c0_23] : memref<2x3x128xf32, #tpu.memory_space<vmem>>, vector<1x3x128xf32>
    %15 = vector.shape_cast %14 : vector<1x3x128xf32> to vector<3x128xf32>
    %c0_24 = arith.constant 0 : index
    %c0_25 = arith.constant 0 : index
    %c0_26 = arith.constant 0 : index
    %16 = vector.load %arg3[%c0_24, %c0_25, %c0_26] : memref<2x1027x128xf32, #tpu.memory_space<vmem>>, vector<1x1027x128xf32>
    %17 = vector.shape_cast %16 : vector<1x1027x128xf32> to vector<1027x128xf32>
    %cst = arith.constant dense<0.000000e+00> : vector<32x128xf32>
    %18 = tpu.matmul %0, %17, %cst {dimension_numbers = #tpu.dot_dimension_numbers<[1], [0], [0], [1], [0, 0, 1, 1], [], []>} : vector<32x1027xf32>, vector<1027x128xf32>, vector<32x128xf32> -> vector<32x128xf32>
    %19 = vector.extract_strided_slice %1 {offsets = [0, 0], sizes = [32, 1], strides = [1, 1]} : vector<32x3xf32> to vector<32x1xf32>
    %20 = vector.extract_strided_slice %15 {offsets = [0, 0], sizes = [1, 128], strides = [1, 1]} : vector<3x128xf32> to vector<1x128xf32>
    %21 = vector.broadcast %19 : vector<32x1xf32> to vector<32x128xf32>
    %22 = vector.broadcast %20 : vector<1x128xf32> to vector<32x128xf32>
    %23 = arith.mulf %21, %22 : vector<32x128xf32>
    %24 = vector.extract_strided_slice %1 {offsets = [0, 1], sizes = [32, 1], strides = [1, 1]} : vector<32x3xf32> to vector<32x1xf32>
    %25 = vector.extract_strided_slice %15 {offsets = [1, 0], sizes = [1, 128], strides = [1, 1]} : vector<3x128xf32> to vector<1x128xf32>
    %26 = vector.broadcast %24 : vector<32x1xf32> to vector<32x128xf32>
    %27 = vector.broadcast %25 : vector<1x128xf32> to vector<32x128xf32>
    %28 = arith.mulf %26, %27 : vector<32x128xf32>
    %29 = arith.addf %23, %28 : vector<32x128xf32>
    %30 = vector.extract_strided_slice %1 {offsets = [0, 2], sizes = [32, 1], strides = [1, 1]} : vector<32x3xf32> to vector<32x1xf32>
    %31 = vector.extract_strided_slice %15 {offsets = [2, 0], sizes = [1, 128], strides = [1, 1]} : vector<3x128xf32> to vector<1x128xf32>
    %32 = vector.broadcast %30 : vector<32x1xf32> to vector<32x128xf32>
    %33 = vector.broadcast %31 : vector<1x128xf32> to vector<32x128xf32>
    %34 = arith.mulf %32, %33 : vector<32x128xf32>
    %35 = arith.addf %29, %34 : vector<32x128xf32>
    %36 = vector.broadcast %2 : vector<32x1xf32> to vector<32x128xf32>
    %37 = arith.mulf %36, %18 : vector<32x128xf32>
    %cst_27 = arith.constant 1.000000e+00 : f32
    %38 = vector.broadcast %cst_27 : f32 to vector<32x1xf32>
    %39 = arith.subf %38, %2 : vector<32x1xf32>
    %40 = vector.broadcast %39 : vector<32x1xf32> to vector<32x128xf32>
    %41 = arith.mulf %40, %35 : vector<32x128xf32>
    %42 = arith.addf %37, %41 : vector<32x128xf32>
    %43 = vector.broadcast %3 : vector<32x1xf32> to vector<32x128xf32>
    %44 = arith.addf %42, %43 : vector<32x128xf32>
    %45 = vector.extract_strided_slice %44 {offsets = [0, 0], sizes = [8, 128], strides = [1, 1]} : vector<32x128xf32> to vector<8x128xf32>
    %46 = vector.extract_strided_slice %44 {offsets = [8, 0], sizes = [8, 128], strides = [1, 1]} : vector<32x128xf32> to vector<8x128xf32>
    %47 = vector.extract_strided_slice %44 {offsets = [16, 0], sizes = [8, 128], strides = [1, 1]} : vector<32x128xf32> to vector<8x128xf32>
    %48 = vector.extract_strided_slice %44 {offsets = [24, 0], sizes = [8, 128], strides = [1, 1]} : vector<32x128xf32> to vector<8x128xf32>
    %cst_28 = arith.constant dense<0.000000e+00> : vector<8xf32>
    %49 = vector.multi_reduction <add>, %13, %cst_28 [1] : vector<8x128xf32> to vector<8xf32>
    %50 = vector.shape_cast %49 : vector<8xf32> to vector<8x1xf32>
    %cst_29 = arith.constant 1.280000e+02 : f32
    %51 = vector.broadcast %cst_29 : f32 to vector<8x1xf32>
    %52 = arith.divf %50, %51 : vector<8x1xf32>
    %53 = vector.broadcast %52 : vector<8x1xf32> to vector<8x128xf32>
    %54 = arith.subf %13, %53 : vector<8x128xf32>
    %55 = arith.mulf %54, %54 : vector<8x128xf32>
    %cst_30 = arith.constant dense<0.000000e+00> : vector<8xf32>
    %56 = vector.multi_reduction <add>, %55, %cst_30 [1] : vector<8x128xf32> to vector<8xf32>
    %57 = vector.shape_cast %56 : vector<8xf32> to vector<8x1xf32>
    %cst_31 = arith.constant 1.280000e+02 : f32
    %58 = vector.broadcast %cst_31 : f32 to vector<8x1xf32>
    %59 = arith.divf %57, %58 : vector<8x1xf32>
    %cst_32 = arith.constant 9.99999974E-6 : f32
    %60 = vector.broadcast %cst_32 : f32 to vector<8x1xf32>
    %61 = arith.addf %59, %60 : vector<8x1xf32>
    %62 = math.rsqrt %61 : vector<8x1xf32>
    %63 = vector.broadcast %62 : vector<8x1xf32> to vector<8x128xf32>
    %64 = arith.mulf %54, %63 : vector<8x128xf32>
    %65 = arith.mulf %64, %46 : vector<8x128xf32>
    %66 = arith.addf %65, %45 : vector<8x128xf32>
    %cst_33 = arith.constant 0.000000e+00 : f32
    %67 = vector.broadcast %cst_33 : f32 to vector<8x128xf32>
    %68 = arith.maximumf %66, %67 : vector<8x128xf32>
    %cst_34 = arith.constant dense<0.000000e+00> : vector<8x128xf32>
    %69 = tpu.matmul %5, %68, %cst_34 {dimension_numbers = #tpu.dot_dimension_numbers<[1], [0], [0], [1], [0, 0, 1, 1], [], []>} : vector<8x8xf32>, vector<8x128xf32>, vector<8x128xf32> -> vector<8x128xf32>
    %70 = vector.broadcast %9 : vector<8x1xf32> to vector<8x128xf32>
    %71 = arith.addf %69, %70 : vector<8x128xf32>
    %cst_35 = arith.constant dense<0.000000e+00> : vector<8xf32>
    %72 = vector.multi_reduction <add>, %71, %cst_35 [1] : vector<8x128xf32> to vector<8xf32>
    %73 = vector.shape_cast %72 : vector<8xf32> to vector<8x1xf32>
    %cst_36 = arith.constant 1.280000e+02 : f32
    %74 = vector.broadcast %cst_36 : f32 to vector<8x1xf32>
    %75 = arith.divf %73, %74 : vector<8x1xf32>
    %76 = vector.broadcast %75 : vector<8x1xf32> to vector<8x128xf32>
    %77 = arith.subf %71, %76 : vector<8x128xf32>
    %78 = arith.mulf %77, %77 : vector<8x128xf32>
    %cst_37 = arith.constant dense<0.000000e+00> : vector<8xf32>
    %79 = vector.multi_reduction <add>, %78, %cst_37 [1] : vector<8x128xf32> to vector<8xf32>
    %80 = vector.shape_cast %79 : vector<8xf32> to vector<8x1xf32>
    %cst_38 = arith.constant 1.280000e+02 : f32
    %81 = vector.broadcast %cst_38 : f32 to vector<8x1xf32>
    %82 = arith.divf %80, %81 : vector<8x1xf32>
    %cst_39 = arith.constant 9.99999974E-6 : f32
    %83 = vector.broadcast %cst_39 : f32 to vector<8x1xf32>
    %84 = arith.addf %82, %83 : vector<8x1xf32>
    %85 = math.rsqrt %84 : vector<8x1xf32>
    %86 = vector.broadcast %85 : vector<8x1xf32> to vector<8x128xf32>
    %87 = arith.mulf %77, %86 : vector<8x128xf32>
    %88 = arith.mulf %87, %48 : vector<8x128xf32>
    %89 = arith.addf %88, %47 : vector<8x128xf32>
    %cst_40 = arith.constant 0.000000e+00 : f32
    %90 = vector.broadcast %cst_40 : f32 to vector<8x128xf32>
    %91 = arith.maximumf %89, %90 : vector<8x128xf32>
    %cst_41 = arith.constant dense<0.000000e+00> : vector<8x128xf32>
    %92 = tpu.matmul %7, %91, %cst_41 {dimension_numbers = #tpu.dot_dimension_numbers<[1], [0], [0], [1], [0, 0, 1, 1], [], []>} : vector<8x8xf32>, vector<8x128xf32>, vector<8x128xf32> -> vector<8x128xf32>
    %93 = vector.broadcast %11 : vector<8x1xf32> to vector<8x128xf32>
    %94 = arith.addf %92, %93 : vector<8x128xf32>
    %95 = arith.addf %71, %94 : vector<8x128xf32>
    %c0_42 = arith.constant 0 : index
    %c0_43 = arith.constant 0 : index
    %c0_44 = arith.constant 0 : index
    %96 = vector.load %arg10[%c0_42, %c0_43, %c0_44] : memref<2x8x128xf32, #tpu.memory_space<vmem>>, vector<1x8x128xf32>
    %97 = vector.shape_cast %96 : vector<1x8x128xf32> to vector<8x128xf32>
    %98 = vector.shape_cast %95 : vector<8x128xf32> to vector<1x8x128xf32>
    tpu.vector_store %arg10[%c0_42, %c0_43, %c0_44], %98 {strides = array<i32>} : memref<2x8x128xf32, #tpu.memory_space<vmem>>, vector<1x8x128xf32>,
    %c1_45 = arith.constant 1 : index
    %c0_46 = arith.constant 0 : index
    %c0_47 = arith.constant 0 : index
    %99 = vector.load %arg1[%c1_45, %c0_46, %c0_47] : memref<2x8x128xf32, #tpu.memory_space<vmem>>, vector<1x8x128xf32>
    %100 = vector.shape_cast %99 : vector<1x8x128xf32> to vector<8x128xf32>
    %c1_48 = arith.constant 1 : index
    %c0_49 = arith.constant 0 : index
    %c0_50 = arith.constant 0 : index
    %101 = vector.load %arg2[%c1_48, %c0_49, %c0_50] : memref<2x3x128xf32, #tpu.memory_space<vmem>>, vector<1x3x128xf32>
    %102 = vector.shape_cast %101 : vector<1x3x128xf32> to vector<3x128xf32>
    %c1_51 = arith.constant 1 : index
    %c0_52 = arith.constant 0 : index
    %c0_53 = arith.constant 0 : index
    %103 = vector.load %arg3[%c1_51, %c0_52, %c0_53] : memref<2x1027x128xf32, #tpu.memory_space<vmem>>, vector<1x1027x128xf32>
    %104 = vector.shape_cast %103 : vector<1x1027x128xf32> to vector<1027x128xf32>
    %cst_54 = arith.constant dense<0.000000e+00> : vector<32x128xf32>
    %105 = tpu.matmul %0, %104, %cst_54 {dimension_numbers = #tpu.dot_dimension_numbers<[1], [0], [0], [1], [0, 0, 1, 1], [], []>} : vector<32x1027xf32>, vector<1027x128xf32>, vector<32x128xf32> -> vector<32x128xf32>
    %106 = vector.extract_strided_slice %1 {offsets = [0, 0], sizes = [32, 1], strides = [1, 1]} : vector<32x3xf32> to vector<32x1xf32>
    %107 = vector.extract_strided_slice %102 {offsets = [0, 0], sizes = [1, 128], strides = [1, 1]} : vector<3x128xf32> to vector<1x128xf32>
    %108 = vector.broadcast %106 : vector<32x1xf32> to vector<32x128xf32>
    %109 = vector.broadcast %107 : vector<1x128xf32> to vector<32x128xf32>
    %110 = arith.mulf %108, %109 : vector<32x128xf32>
    %111 = vector.extract_strided_slice %1 {offsets = [0, 1], sizes = [32, 1], strides = [1, 1]} : vector<32x3xf32> to vector<32x1xf32>
    %112 = vector.extract_strided_slice %102 {offsets = [1, 0], sizes = [1, 128], strides = [1, 1]} : vector<3x128xf32> to vector<1x128xf32>
    %113 = vector.broadcast %111 : vector<32x1xf32> to vector<32x128xf32>
    %114 = vector.broadcast %112 : vector<1x128xf32> to vector<32x128xf32>
    %115 = arith.mulf %113, %114 : vector<32x128xf32>
    %116 = arith.addf %110, %115 : vector<32x128xf32>
    %117 = vector.extract_strided_slice %1 {offsets = [0, 2], sizes = [32, 1], strides = [1, 1]} : vector<32x3xf32> to vector<32x1xf32>
    %118 = vector.extract_strided_slice %102 {offsets = [2, 0], sizes = [1, 128], strides = [1, 1]} : vector<3x128xf32> to vector<1x128xf32>
    %119 = vector.broadcast %117 : vector<32x1xf32> to vector<32x128xf32>
    %120 = vector.broadcast %118 : vector<1x128xf32> to vector<32x128xf32>
    %121 = arith.mulf %119, %120 : vector<32x128xf32>
    %122 = arith.addf %116, %121 : vector<32x128xf32>
    %123 = vector.broadcast %2 : vector<32x1xf32> to vector<32x128xf32>
    %124 = arith.mulf %123, %105 : vector<32x128xf32>
    %cst_55 = arith.constant 1.000000e+00 : f32
    %125 = vector.broadcast %cst_55 : f32 to vector<32x1xf32>
    %126 = arith.subf %125, %2 : vector<32x1xf32>
    %127 = vector.broadcast %126 : vector<32x1xf32> to vector<32x128xf32>
    %128 = arith.mulf %127, %122 : vector<32x128xf32>
    %129 = arith.addf %124, %128 : vector<32x128xf32>
    %130 = vector.broadcast %3 : vector<32x1xf32> to vector<32x128xf32>
    %131 = arith.addf %129, %130 : vector<32x128xf32>
    %132 = vector.extract_strided_slice %131 {offsets = [0, 0], sizes = [8, 128], strides = [1, 1]} : vector<32x128xf32> to vector<8x128xf32>
    %133 = vector.extract_strided_slice %131 {offsets = [8, 0], sizes = [8, 128], strides = [1, 1]} : vector<32x128xf32> to vector<8x128xf32>
    %134 = vector.extract_strided_slice %131 {offsets = [16, 0], sizes = [8, 128], strides = [1, 1]} : vector<32x128xf32> to vector<8x128xf32>
    %135 = vector.extract_strided_slice %131 {offsets = [24, 0], sizes = [8, 128], strides = [1, 1]} : vector<32x128xf32> to vector<8x128xf32>
    %cst_56 = arith.constant dense<0.000000e+00> : vector<8xf32>
    %136 = vector.multi_reduction <add>, %100, %cst_56 [1] : vector<8x128xf32> to vector<8xf32>
    %137 = vector.shape_cast %136 : vector<8xf32> to vector<8x1xf32>
    %cst_57 = arith.constant 1.280000e+02 : f32
    %138 = vector.broadcast %cst_57 : f32 to vector<8x1xf32>
    %139 = arith.divf %137, %138 : vector<8x1xf32>
    %140 = vector.broadcast %139 : vector<8x1xf32> to vector<8x128xf32>
    %141 = arith.subf %100, %140 : vector<8x128xf32>
    %142 = arith.mulf %141, %141 : vector<8x128xf32>
    %cst_58 = arith.constant dense<0.000000e+00> : vector<8xf32>
    %143 = vector.multi_reduction <add>, %142, %cst_58 [1] : vector<8x128xf32> to vector<8xf32>
    %144 = vector.shape_cast %143 : vector<8xf32> to vector<8x1xf32>
    %cst_59 = arith.constant 1.280000e+02 : f32
    %145 = vector.broadcast %cst_59 : f32 to vector<8x1xf32>
    %146 = arith.divf %144, %145 : vector<8x1xf32>
    %cst_60 = arith.constant 9.99999974E-6 : f32
    %147 = vector.broadcast %cst_60 : f32 to vector<8x1xf32>
    %148 = arith.addf %146, %147 : vector<8x1xf32>
    %149 = math.rsqrt %148 : vector<8x1xf32>
    %150 = vector.broadcast %149 : vector<8x1xf32> to vector<8x128xf32>
    %151 = arith.mulf %141, %150 : vector<8x128xf32>
    %152 = arith.mulf %151, %133 : vector<8x128xf32>
    %153 = arith.addf %152, %132 : vector<8x128xf32>
    %cst_61 = arith.constant 0.000000e+00 : f32
    %154 = vector.broadcast %cst_61 : f32 to vector<8x128xf32>
    %155 = arith.maximumf %153, %154 : vector<8x128xf32>
    %cst_62 = arith.constant dense<0.000000e+00> : vector<8x128xf32>
    %156 = tpu.matmul %5, %155, %cst_62 {dimension_numbers = #tpu.dot_dimension_numbers<[1], [0], [0], [1], [0, 0, 1, 1], [], []>} : vector<8x8xf32>, vector<8x128xf32>, vector<8x128xf32> -> vector<8x128xf32>
    %157 = vector.broadcast %9 : vector<8x1xf32> to vector<8x128xf32>
    %158 = arith.addf %156, %157 : vector<8x128xf32>
    %cst_63 = arith.constant dense<0.000000e+00> : vector<8xf32>
    %159 = vector.multi_reduction <add>, %158, %cst_63 [1] : vector<8x128xf32> to vector<8xf32>
    %160 = vector.shape_cast %159 : vector<8xf32> to vector<8x1xf32>
    %cst_64 = arith.constant 1.280000e+02 : f32
    %161 = vector.broadcast %cst_64 : f32 to vector<8x1xf32>
    %162 = arith.divf %160, %161 : vector<8x1xf32>
    %163 = vector.broadcast %162 : vector<8x1xf32> to vector<8x128xf32>
    %164 = arith.subf %158, %163 : vector<8x128xf32>
    %165 = arith.mulf %164, %164 : vector<8x128xf32>
    %cst_65 = arith.constant dense<0.000000e+00> : vector<8xf32>
    %166 = vector.multi_reduction <add>, %165, %cst_65 [1] : vector<8x128xf32> to vector<8xf32>
    %167 = vector.shape_cast %166 : vector<8xf32> to vector<8x1xf32>
    %cst_66 = arith.constant 1.280000e+02 : f32
    %168 = vector.broadcast %cst_66 : f32 to vector<8x1xf32>
    %169 = arith.divf %167, %168 : vector<8x1xf32>
    %cst_67 = arith.constant 9.99999974E-6 : f32
    %170 = vector.broadcast %cst_67 : f32 to vector<8x1xf32>
    %171 = arith.addf %169, %170 : vector<8x1xf32>
    %172 = math.rsqrt %171 : vector<8x1xf32>
    %173 = vector.broadcast %172 : vector<8x1xf32> to vector<8x128xf32>
    %174 = arith.mulf %164, %173 : vector<8x128xf32>
    %175 = arith.mulf %174, %135 : vector<8x128xf32>
    %176 = arith.addf %175, %134 : vector<8x128xf32>
    %cst_68 = arith.constant 0.000000e+00 : f32
    %177 = vector.broadcast %cst_68 : f32 to vector<8x128xf32>
    %178 = arith.maximumf %176, %177 : vector<8x128xf32>
    %cst_69 = arith.constant dense<0.000000e+00> : vector<8x128xf32>
    %179 = tpu.matmul %7, %178, %cst_69 {dimension_numbers = #tpu.dot_dimension_numbers<[1], [0], [0], [1], [0, 0, 1, 1], [], []>} : vector<8x8xf32>, vector<8x128xf32>, vector<8x128xf32> -> vector<8x128xf32>
    %180 = vector.broadcast %11 : vector<8x1xf32> to vector<8x128xf32>
    %181 = arith.addf %179, %180 : vector<8x128xf32>
    %182 = arith.addf %158, %181 : vector<8x128xf32>
    %c1_70 = arith.constant 1 : index
    %c0_71 = arith.constant 0 : index
    %c0_72 = arith.constant 0 : index
    %183 = vector.load %arg10[%c1_70, %c0_71, %c0_72] : memref<2x8x128xf32, #tpu.memory_space<vmem>>, vector<1x8x128xf32>
    %184 = vector.shape_cast %183 : vector<1x8x128xf32> to vector<8x128xf32>
    %185 = vector.shape_cast %182 : vector<8x128xf32> to vector<1x8x128xf32>
    tpu.vector_store %arg10[%c1_70, %c0_71, %c0_72], %185 {strides = array<i32>} : memref<2x8x128xf32, #tpu.memory_space<vmem>>, vector<1x8x128xf32>,
    return
  }
  func.func @transform_0(%arg0: i32) -> (i32, i32, i32) {
    %c0_i32 = arith.constant 0 : i32
    %c0_i32_0 = arith.constant 0 : i32
    %c0_i32_1 = arith.constant 0 : i32
    return %arg0, %c0_i32, %c0_i32_0 : i32, i32, i32
  }
  func.func @transform_1(%arg0: i32) -> (i32, i32, i32) {
    %c0_i32 = arith.constant 0 : i32
    %c0_i32_0 = arith.constant 0 : i32
    %c0_i32_1 = arith.constant 0 : i32
    return %arg0, %c0_i32, %c0_i32_0 : i32, i32, i32
  }
  func.func @transform_2(%arg0: i32) -> (i32, i32, i32) {
    %c0_i32 = arith.constant 0 : i32
    %c0_i32_0 = arith.constant 0 : i32
    %c0_i32_1 = arith.constant 0 : i32
    return %arg0, %c0_i32, %c0_i32_0 : i32, i32, i32
  }
  func.func @transform_3(%arg0: i32) -> (i32, i32) {
    %c0_i32 = arith.constant 0 : i32
    %c0_i32_0 = arith.constant 0 : i32
    %c0_i32_1 = arith.constant 0 : i32
    return %c0_i32, %c0_i32_0 : i32, i32
  }
  func.func @transform_4(%arg0: i32) -> (i32, i32) {
    %c0_i32 = arith.constant 0 : i32
    %c0_i32_0 = arith.constant 0 : i32
    %c0_i32_1 = arith.constant 0 : i32
    return %c0_i32, %c0_i32_0 : i32, i32
  }
  func.func @transform_5(%arg0: i32) -> (i32, i32) {
    %c0_i32 = arith.constant 0 : i32
    %c0_i32_0 = arith.constant 0 : i32
    %c0_i32_1 = arith.constant 0 : i32
    return %c0_i32, %c0_i32_0 : i32, i32
  }
  func.func @transform_6(%arg0: i32) -> (i32, i32) {
    %c0_i32 = arith.constant 0 : i32
    %c0_i32_0 = arith.constant 0 : i32
    %c0_i32_1 = arith.constant 0 : i32
    return %c0_i32, %c0_i32_0 : i32, i32
  }
  func.func @transform_7(%arg0: i32) -> (i32, i32, i32) {
    %c0_i32 = arith.constant 0 : i32
    %c0_i32_0 = arith.constant 0 : i32
    %c0_i32_1 = arith.constant 0 : i32
    %c0_i32_2 = arith.constant 0 : i32
    return %c0_i32, %c0_i32_0, %c0_i32_1 : i32, i32, i32
  }
  func.func @transform_8(%arg0: i32) -> (i32, i32, i32) {
    %c0_i32 = arith.constant 0 : i32
    %c0_i32_0 = arith.constant 0 : i32
    %c0_i32_1 = arith.constant 0 : i32
    %c0_i32_2 = arith.constant 0 : i32
    return %c0_i32, %c0_i32_0, %c0_i32_1 : i32, i32, i32
  }
  func.func @transform_9(%arg0: i32) -> (i32, i32, i32) {
    %c0_i32 = arith.constant 0 : i32
    %c0_i32_0 = arith.constant 0 : i32
    %c0_i32_1 = arith.constant 0 : i32
    return %arg0, %c0_i32, %c0_i32_0 : i32, i32, i32
  }
}

</mosaic_0001>

<bundles_post_ra>
// kernel: ffadain_resblock.1
= control target key start
LH: loop header
LB: loop body
LE: loop exit
PB: predicated region body
PF: predicated region fallthrough
CT: control target
= control target key end

     0   :  { %s4189_s0 = inlined_call_operand.vmem [shape: f32[4,8,128], index: 0, kind: input, shape index: {}]   ;;  %s4190_s1 = inlined_call_operand.vmem [shape: f32[4,3,128], index: 1, kind: input, shape index: {}]   ;;  %s4191_s2 = inlined_call_operand.vmem [shape: f32[4,1027,128], index: 2, kind: input, shape index: {}]   ;;  %s4192_s3 = inlined_call_operand.vmem [shape: f32[32,1027], index: 3, kind: input, shape index: {}]   ;;  %s4193_s4 = inlined_call_operand.vmem [shape: f32[32,3], index: 4, kind: input, shape index: {}]   ;;  %s4194_s5 = inlined_call_operand.vmem [shape: f32[32,1], index: 5, kind: input, shape index: {}]   ;;  %s4195_s6 = inlined_call_operand.vmem [shape: f32[32,1], index: 6, kind: input, shape index: {}]   ;;  %s4196_s7 = inlined_call_operand.vmem [shape: f32[2,8,8], index: 7, kind: input, shape index: {}]   ;;  %s4197_s8 = inlined_call_operand.vmem [shape: f32[2,8,1], index: 8, kind: input, shape index: {}]   ;;  %s4198_s9 = inlined_call_operand.hbm [shape: f32[4,8,128], index: 9, kind: output, shape index: {}]  }
   0x1   :  { %4202 = sst [smem:[#allocation5_spill]] %s4189_s0 }
   0x2   :  { %14 = vsyncpa [#allocation3], 0 }
   0x3   :  { %16 = vsyncpa [#allocation3 + $0x1], 0  ;;  %s3272_s30 = smov 0   ;;  %s3274_s10 = smov 0  }
   0x4   :  { %s3276_s11 = smov 0   ;;  %s3278_s12 = smov 0  }
   0x5 LB: > { %s3293_s13 = sadd.s32 4294967295, %s3212_s12   ;;  %s2241_s14 = sadd.s32 4294967294, %s3212_s12   ;;  %s3212_s12 = sphi %s3278_s12, %s4211_s12   ;;  %s3208_s11 = sphi %s3276_s11, %s4210_s11   ;;  %s3204_s10 = sphi %s3274_s10, %s4209_s10   ;;  %s3200_s30 = sphi %s3272_s30, %s4208_s30  }
   0x6   : > { %s3297_s15 = sadd.s32 1, %s3212_s12   ;;  %s233_s16 = sadd.s32 1, %s3208_s11 }
   0x7   : > { %s230_s17 = ssub.s32 %s3212_s12, %s3297_s15  ;;  %p243_p0 = scmp.ne.s32.totalorder %s3208_s11, %s3204_s10 }
   0x8   : > { %p231_p1 = scmp.eq.s32.totalorder %s230_s17, 0  ;;  %p244_p2 = scmp.eq.s32.totalorder %s3293_s13, 1 }
   0x9   : > { %p249_p3 = scmp.ne.s32.totalorder %s3204_s10, %s3200_s30  ;;  %p250_p4 = scmp.eq.s32.totalorder %s2241_s14, 1 }
   0xa   : > { %s3308_s18 = scalar_select %p231_p1, %s3208_s11, %s233_s16  }
   0xb   : > { %p3310_p5 = por %p244_p2, %p243_p0  ;;  %p3314_p6 = por %p250_p4, %p249_p3 }
   0xc   : > { %p2244_p7 = scmp.ge.s32.totalorder %s3212_s12, 1  ;;  %p314_p8 = scmp.lt.s32.totalorder %s3212_s12, 3 }
   0xe   : > { %p315_p9 = pnand %p2244_p7, %p314_p8 }
   0xf   : > { %s2246_s21 = sshll.u32 (!%p315_p9), %s3293_s13, 1  ;;  %v3324_v0 = vld [vmem:[%s4192_s3 + $0x8] sm:$0xff] (!%p315_p9)  ;;  %v384_v1 = vld [vmem:[%s4192_s3 + $0x18] sm:$0xff] (!%p315_p9)  ;;  %v4200_v2 = vmov (!%p315_p9), 0   ;;  %s4205_s0 = sld [smem:[#allocation5_spill]] (!%p315_p9)  ;;  %vm579_vm0 = vcmask (!%p315_p9), 1042432  }
  0x10   : > { %318 = sbr.rel (%p315_p9) target bundleno = 1929 (0x789), region = 56  ;;  %p362_p10 = scmp.lt.s32.totalorder (!%p315_p9), %s2246_s21, 3  ;;  %647 = vmatprep.mubr.f32.mxu0 (!%p315_p9), %v3324_v0  ;;  %732 = vmatprep.mubr.f32.mxu1 (!%p315_p9), %v384_v1  ;;  %vm566_vm1 = vcmask (!%p315_p9), 23552   ;;  %vm3218_vm2 = vmmov (!%p315_p9), 0   ;;  %vm1192_vm3 = vcmask (!%p315_p9), 64512  }
  0x11   : > { %3115 = vset.pattern.permute.xlu1 (!%p315_p9), %v4200_v2  ;;  %3117 = vset.pattern.permute.xlu0 (!%p315_p9), %v4200_v2  ;;  %s358_s25 = sand.u32 (!%p315_p9), 1, %s3204_s10  }
  0x17   : > { %s4213_s21 = smov (!%p362_p10, %s2246_s21), 3 }
  0x18   : > { %s2247_s26 = sshll.u32 %s4213_s21, 3  ;;  %s3068_s14 = smul.u32 1032, %s4213_s21 }
  0x19   : > { %s3338_s29 = scalar_lea.vmem %s4205_s0, %s2247_s26  ;;  %s2249_s16 = sshll.u32 %s4213_s21, 2 }
  0x1a   : > { %v3342_v3 = vld [vmem:[%s3338_s29] sm:$0xff]  ;;  %s3348_s22 = scalar_lea.vmem %s4191_s2, %s3068_s14  ;;  %s3551_s23 = scalar_lea.vmem %s4190_s1, %s2249_s16 }
  0x1b   : > { %1172 = vadd.xlane.f32.xlu0 %v3342_v3  ;;  %v453_v4 = vld [vmem:[%s3348_s22 + $0x80] sm:$0xff]  ;;  %v454_v5 = vld [vmem:[%s3348_s22 + $0x88] sm:$0xff]  ;;  %v455_v15 = vld [vmem:[%s3348_s22 + $0x90] sm:$0xff]  ;;  %s2245_s26 = sshll.u32 %s358_s25, 4  ;;  %s2405_s0 = sshll.u32 %s3293_s13, 8 }
  0x1c   : > { %v437_v6 = vld [vmem:[%s3348_s22] sm:$0xff]  ;;  %v2812_v7 = vpack.c.bf16 %v454_v5, %v453_v4  ;;  %v438_v8 = vld [vmem:[%s3348_s22 + $0x8] sm:$0xff]  ;;  %v456_v17 = vld [vmem:[%s3348_s22 + $0x98] sm:$0xff]  ;;  %s360_s27 = scalar_lea.vmem [#allocation2], %s2245_s26  ;;  %s4144_s14 = scalar_lea.hbm %s4198_s9, %s2405_s0 }
  0x1d   : > { %v485_v9 = vld [vmem:[%s3348_s22 + $0x180] sm:$0xff]  ;;  %v486_v10 = vld [vmem:[%s3348_s22 + $0x188] sm:$0xff]  ;;  %v2814_v11 = vpack.c.bf16 %v438_v8, %v437_v6  ;;  %v439_v18 = vld [vmem:[%s3348_s22 + $0x10] sm:$0xff]  ;;  %v2816_v20 = vpack.c.bf16 %v456_v17, %v455_v15  ;;  %s4148_s16 = scalar_lea.sflag [#allocation3], %s358_s25  ;;  %s3219_s13 = smov [#allocation2]  }
  0x1e   : > { %v2844_v12 = vpack.c.bf16 %v486_v10, %v485_v9  ;;  %v469_v13 = vld [vmem:[%s3348_s22 + $0x100] sm:$0xff]  ;;  %v470_v14 = vld [vmem:[%s3348_s22 + $0x108] sm:$0xff]  ;;  %2813 = vmatprep.subr.bf16.mxu0 %v2812_v7  ;;  %v440_v19 = vld [vmem:[%s3348_s22 + $0x18] sm:$0xff]  ;;  %s3154_s17 = sshll.u32 %s3219_s13, 4  ;;  %s3155_s17 = int_to_ptr.vmem [resolvable:$false] %s3154_s17 }
  0x1f   : > { %v2846_v16 = vpack.c.bf16 %v470_v14, %v469_v13  ;;  %2815 = vmatpush3.bf16.msra.mxu0 %v2814_v11  ;;  %v2818_v21 = vpack.c.bf16 %v440_v19, %v439_v18  ;;  %v487_v22 = vld [vmem:[%s3348_s22 + $0x190] sm:$0xff]  ;;  %v488_v23 = vld [vmem:[%s3348_s22 + $0x198] sm:$0xff]  ;;  %v457_v27 = vld [vmem:[%s3348_s22 + $0xa0] sm:$0xff]  ;;  %s3156_s24 = scalar_lea.vmem %s3155_s17, 512 }
  0x20   : > { %2845 = vmatprep.subr.bf16.mxu1 %v2844_v12  ;;  %v471_v24 = vld [vmem:[%s3348_s22 + $0x110] sm:$0xff]  ;;  %v2848_v25 = vpack.c.bf16 %v488_v23, %v487_v22  ;;  %v472_v26 = vld [vmem:[%s3348_s22 + $0x118] sm:$0xff]  ;;  %v458_v28 = vld [vmem:[%s3348_s22 + $0xa8] sm:$0xff]  ;;  %2817 = vmatprep.subr.bf16.mxu0 %v2816_v20 }
  0x21   : > { %2847 = vmatpush3.bf16.msra.mxu1 %v2846_v16  ;;  %v2850_v29 = vpack.c.bf16 %v472_v26, %v471_v24  ;;  %v2820_v30 = vpack.c.bf16 %v458_v28, %v457_v27  ;;  %v441_v31 = vld [vmem:[%s3348_s22 + $0x20] sm:$0xff]  ;;  %v442_v32 = vld [vmem:[%s3348_s22 + $0x28] sm:$0xff]  ;;  %v459_v39 = vld [vmem:[%s3348_s22 + $0xb0] sm:$0xff] }
  0x22   : > { %v489_v33 = vld [vmem:[%s3348_s22 + $0x1a0] sm:$0xff]  ;;  %2849 = vmatprep.subr.bf16.mxu1 %v2848_v25  ;;  %v490_v34 = vld [vmem:[%s3348_s22 + $0x1a8] sm:$0xff]  ;;  %v2822_v37 = vpack.c.bf16 %v442_v32, %v441_v31  ;;  %v460_v40 = vld [vmem:[%s3348_s22 + $0xb8] sm:$0xff] }
  0x23   : > { %v473_v35 = vld [vmem:[%s3348_s22 + $0x120] sm:$0xff]  ;;  %v474_v36 = vld [vmem:[%s3348_s22 + $0x128] sm:$0xff]  ;;  %2819 = vmatpush3.bf16.msra.mxu0 %v2818_v21  ;;  %v2852_v38 = vpack.c.bf16 %v490_v34, %v489_v33  ;;  %v443_v41 = vld [vmem:[%s3348_s22 + $0x30] sm:$0xff]  ;;  %v2824_v43 = vpack.c.bf16 %v460_v40, %v459_v39 }
  0x24   : > { %2821 = vmatprep.subr.bf16.mxu0 %v2820_v30  ;;  %v2854_v42 = vpack.c.bf16 %v474_v36, %v473_v35  ;;  %v444_v44 = vld [vmem:[%s3348_s22 + $0x38] sm:$0xff]  ;;  %v491_v45 = vld [vmem:[%s3348_s22 + $0x1b0] sm:$0xff]  ;;  %v461_v50 = vld [vmem:[%s3348_s22 + $0xc0] sm:$0xff] }
  0x25   : > { %2851 = vmatpush3.bf16.msra.mxu1 %v2850_v29  ;;  %v492_v46 = vld [vmem:[%s3348_s22 + $0x1b8] sm:$0xff]  ;;  %v475_v48 = vld [vmem:[%s3348_s22 + $0x130] sm:$0xff]  ;;  %v462_v51 = vld [vmem:[%s3348_s22 + $0xc8] sm:$0xff]  ;;  %v2826_v52 = vpack.c.bf16 %v444_v44, %v443_v41 }
  0x26   : > { %2853 = vmatprep.subr.bf16.mxu1 %v2852_v38  ;;  %v2856_v47 = vpack.c.bf16 %v492_v46, %v491_v45  ;;  %v476_v49 = vld [vmem:[%s3348_s22 + $0x138] sm:$0xff]  ;;  %v493_v53 = vld [vmem:[%s3348_s22 + $0x1c0] sm:$0xff]  ;;  %v494_v54 = vld [vmem:[%s3348_s22 + $0x1c8] sm:$0xff]  ;;  %v2828_v56 = vpack.c.bf16 %v462_v51, %v461_v50 }
  0x27   : > { %2823 = vmatpush3.bf16.msra.mxu0 %v2822_v37  ;;  %v2858_v55 = vpack.c.bf16 %v476_v49, %v475_v48  ;;  %v445_v57 = vld [vmem:[%s3348_s22 + $0x40] sm:$0xff]  ;;  %v446_v58 = vld [vmem:[%s3348_s22 + $0x48] sm:$0xff]  ;;  %v2860_v60 = vpack.c.bf16 %v494_v54, %v493_v53  ;;  %v463_v62 = vld [vmem:[%s3348_s22 + $0xd0] sm:$0xff] }
  0x28   : > { %2825 = vmatprep.subr.bf16.mxu0 %v2824_v43  ;;  %v477_v59 = vld [vmem:[%s3348_s22 + $0x140] sm:$0xff]  ;;  %v478_v61 = vld [vmem:[%s3348_s22 + $0x148] sm:$0xff]  ;;  %v464_v63 = vld [vmem:[%s3348_s22 + $0xd8] sm:$0xff]  ;;  %v2830_v5 = vpack.c.bf16 %v446_v58, %v445_v57 }
  0x29   : > { %2855 = vmatpush3.bf16.msra.mxu1 %v2854_v42  ;;  %v495_v1 = vld [vmem:[%s3348_s22 + $0x1d0] sm:$0xff]  ;;  %v496_v4 = vld [vmem:[%s3348_s22 + $0x1d8] sm:$0xff]  ;;  %v2862_v6 = vpack.c.bf16 %v478_v61, %v477_v59  ;;  %v2832_v7 = vpack.c.bf16 %v464_v63, %v463_v62  ;;  %v465_v13 = vld [vmem:[%s3348_s22 + $0xe0] sm:$0xff] }
  0x2a   : > { %2857 = vmatprep.subr.bf16.mxu1 %v2856_v47  ;;  %v447_v8 = vld [vmem:[%s3348_s22 + $0x50] sm:$0xff]  ;;  %v448_v9 = vld [vmem:[%s3348_s22 + $0x58] sm:$0xff]  ;;  %v2864_v11 = vpack.c.bf16 %v496_v4, %v495_v1  ;;  %v466_v14 = vld [vmem:[%s3348_s22 + $0xe8] sm:$0xff] }
  0x2b   : > { %2827 = vmatpush3.bf16.msra.mxu0 %v2826_v52  ;;  %v479_v10 = vld [vmem:[%s3348_s22 + $0x150] sm:$0xff]  ;;  %v480_v12 = vld [vmem:[%s3348_s22 + $0x158] sm:$0xff]  ;;  %v497_v15 = vld [vmem:[%s3348_s22 + $0x1e0] sm:$0xff]  ;;  %v2834_v17 = vpack.c.bf16 %v448_v9, %v447_v8  ;;  %v2836_v19 = vpack.c.bf16 %v466_v14, %v465_v13 }
  0x2c   : > { %2829 = vmatprep.subr.bf16.mxu0 %v2828_v56  ;;  %v498_v16 = vld [vmem:[%s3348_s22 + $0x1e8] sm:$0xff]  ;;  %v2866_v18 = vpack.c.bf16 %v480_v12, %v479_v10  ;;  %v449_v20 = vld [vmem:[%s3348_s22 + $0x60] sm:$0xff]  ;;  %v467_v25 = vld [vmem:[%s3348_s22 + $0xf0] sm:$0xff] }
  0x2d   : > { %2859 = vmatpush3.bf16.msra.mxu1 %v2858_v55  ;;  %v450_v21 = vld [vmem:[%s3348_s22 + $0x68] sm:$0xff]  ;;  %v481_v22 = vld [vmem:[%s3348_s22 + $0x160] sm:$0xff]  ;;  %v2868_v23 = vpack.c.bf16 %v498_v16, %v497_v15  ;;  %v468_v26 = vld [vmem:[%s3348_s22 + $0xf8] sm:$0xff] }
  0x2e   : > { %2861 = vmatprep.subr.bf16.mxu1 %v2860_v60  ;;  %v482_v24 = vld [vmem:[%s3348_s22 + $0x168] sm:$0xff]  ;;  %v499_v27 = vld [vmem:[%s3348_s22 + $0x1f0] sm:$0xff]  ;;  %v500_v28 = vld [vmem:[%s3348_s22 + $0x1f8] sm:$0xff]  ;;  %v2838_v29 = vpack.c.bf16 %v450_v21, %v449_v20  ;;  %v2840_v31 = vpack.c.bf16 %v468_v26, %v467_v25 }
  0x2f   : > { %2831 = vmatpush3.bf16.msra.mxu0 %v2830_v5  ;;  %v2870_v30 = vpack.c.bf16 %v482_v24, %v481_v22  ;;  %v451_v32 = vld [vmem:[%s3348_s22 + $0x70] sm:$0xff]  ;;  %v452_v33 = vld [vmem:[%s3348_s22 + $0x78] sm:$0xff]  ;;  %v2872_v35 = vpack.c.bf16 %v500_v28, %v499_v27  ;;  %v517_v37 = vld [vmem:[%s3348_s22 + $0x280] sm:$0xff] }
  0x30   : > { %2833 = vmatprep.subr.bf16.mxu0 %v2832_v7  ;;  %v483_v34 = vld [vmem:[%s3348_s22 + $0x170] sm:$0xff]  ;;  %v484_v36 = vld [vmem:[%s3348_s22 + $0x178] sm:$0xff]  ;;  %v518_v38 = vld [vmem:[%s3348_s22 + $0x288] sm:$0xff]  ;;  %v2842_v41 = vpack.c.bf16 %v452_v33, %v451_v32 }
  0x31   : > { %2863 = vmatpush3.bf16.msra.mxu1 %v2862_v6  ;;  %v549_v39 = vld [vmem:[%s3348_s22 + $0x380] sm:$0xff]  ;;  %v550_v40 = vld [vmem:[%s3348_s22 + $0x388] sm:$0xff]  ;;  %v2874_v42 = vpack.c.bf16 %v484_v36, %v483_v34  ;;  %v2876_v43 = vpack.c.bf16 %v518_v38, %v517_v37  ;;  %v519_v49 = vld [vmem:[%s3348_s22 + $0x290] sm:$0xff] }
  0x32   : > { %2865 = vmatprep.subr.bf16.mxu1 %v2864_v11  ;;  %v501_v44 = vld [vmem:[%s3348_s22 + $0x200] sm:$0xff]  ;;  %v502_v45 = vld [vmem:[%s3348_s22 + $0x208] sm:$0xff]  ;;  %v2908_v47 = vpack.c.bf16 %v550_v40, %v549_v39  ;;  %v520_v50 = vld [vmem:[%s3348_s22 + $0x298] sm:$0xff] }
  0x33   : > { %2835 = vmatpush3.bf16.msra.mxu0 %v2834_v17  ;;  %v533_v46 = vld [vmem:[%s3348_s22 + $0x300] sm:$0xff]  ;;  %v534_v48 = vld [vmem:[%s3348_s22 + $0x308] sm:$0xff]  ;;  %v551_v51 = vld [vmem:[%s3348_s22 + $0x390] sm:$0xff]  ;;  %v2878_v54 = vpack.c.bf16 %v502_v45, %v501_v44  ;;  %v2880_v57 = vpack.c.bf16 %v520_v50, %v519_v49 }
  0x34   : > { %2837 = vmatprep.subr.bf16.mxu0 %v2836_v19  ;;  %v552_v52 = vld [vmem:[%s3348_s22 + $0x398] sm:$0xff]  ;;  %v3429_v53 = vld [vmem:[%s4192_s3] sm:$0xff]  ;;  %v383_v55 = vld [vmem:[%s4192_s3 + $0x10] sm:$0xff]  ;;  %v2910_v56 = vpack.c.bf16 %v534_v48, %v533_v46 }
  0x35   : > { %2867 = vmatpush3.bf16.msra.mxu1 %v2866_v18  ;;  %v503_v58 = vld [vmem:[%s3348_s22 + $0x210] sm:$0xff]  ;;  %v504_v59 = vld [vmem:[%s3348_s22 + $0x218] sm:$0xff]  ;;  %v2912_v61 = vpack.c.bf16 %v552_v52, %v551_v51  ;;  %v521_v63 = vld [vmem:[%s3348_s22 + $0x2a0] sm:$0xff] }
  0x36   : > { %2869 = vmatprep.subr.bf16.mxu1 %v2868_v23  ;;  %v535_v60 = vld [vmem:[%s3348_s22 + $0x310] sm:$0xff]  ;;  %v536_v62 = vld [vmem:[%s3348_s22 + $0x318] sm:$0xff]  ;;  %v522_v1 = vld [vmem:[%s3348_s22 + $0x2a8] sm:$0xff]  ;;  %v2882_v7 = vpack.c.bf16 %v504_v59, %v503_v58 }
  0x37   : > { %2839 = vmatpush3.bf16.msra.mxu0 %v2838_v29  ;;  %v553_v4 = vld [vmem:[%s3348_s22 + $0x3a0] sm:$0xff]  ;;  %v554_v5 = vld [vmem:[%s3348_s22 + $0x3a8] sm:$0xff]  ;;  %v3446_v6 = vld [vmem:[%s4192_s3 + $0x50] sm:$0xff]  ;;  %v2914_v11 = vpack.c.bf16 %v536_v62, %v535_v60  ;;  %v2884_v12 = vpack.c.bf16 %v522_v1, %v521_v63 }
  0x38   : > { %2841 = vmatprep.subr.bf16.mxu0 %v2840_v31  ;;  %v3451_v8 = vld [vmem:[%s4192_s3 + $0x48] sm:$0xff]  ;;  %v393_v9 = vld [vmem:[%s4192_s3 + $0x60] sm:$0xff]  ;;  %v392_v10 = vld [vmem:[%s4192_s3 + $0x58] sm:$0xff]  ;;  %v2916_v16 = vpack.c.bf16 %v554_v5, %v553_v4 }
  0x39   : > { %2871 = vmatpush3.bf16.msra.mxu1 %v2870_v30  ;;  %v505_v13 = vld [vmem:[%s3348_s22 + $0x220] sm:$0xff]  ;;  %v506_v14 = vld [vmem:[%s3348_s22 + $0x228] sm:$0xff]  ;;  %v523_v18 = vld [vmem:[%s3348_s22 + $0x2b0] sm:$0xff] }
  0x3a   : > { %2873 = vmatprep.subr.bf16.mxu1 %v2872_v35  ;;  %v537_v15 = vld [vmem:[%s3348_s22 + $0x320] sm:$0xff]  ;;  %v538_v17 = vld [vmem:[%s3348_s22 + $0x328] sm:$0xff]  ;;  %v524_v19 = vld [vmem:[%s3348_s22 + $0x2b8] sm:$0xff]  ;;  %v2886_v23 = vpack.c.bf16 %v506_v14, %v505_v13 }
  0x3b   : > { %2843 = vmatpush3.bf16.msra.mxu0 %v2842_v41  ;;  %v555_v20 = vld [vmem:[%s3348_s22 + $0x3b0] sm:$0xff]  ;;  %v556_v21 = vld [vmem:[%s3348_s22 + $0x3b8] sm:$0xff]  ;;  %v402_v25 = vld [vmem:[%s4192_s3 + $0xa8] sm:$0xff]  ;;  %v2918_v27 = vpack.c.bf16 %v538_v17, %v537_v15  ;;  %v2888_v28 = vpack.c.bf16 %v524_v19, %v523_v18 }
  0x3c   : > { %2877 = vmatprep.subr.bf16.mxu0 %v2876_v43  ;;  %v3472_v22 = vld [vmem:[%s4192_s3 + $0x98] sm:$0xff]  ;;  %v3477_v24 = vld [vmem:[%s4192_s3 + $0x90] sm:$0xff]  ;;  %v401_v26 = vld [vmem:[%s4192_s3 + $0xa0] sm:$0xff]  ;;  %v2920_v32 = vpack.c.bf16 %v556_v21, %v555_v20  ;;  %v1028_v21 = vlaneseq }
  0x3d   : > { %2875 = vmatpush3.bf16.msra.mxu1 %v2874_v42  ;;  %v507_v29 = vld [vmem:[%s3348_s22 + $0x230] sm:$0xff]  ;;  %v508_v30 = vld [vmem:[%s3348_s22 + $0x238] sm:$0xff]  ;;  %v525_v34 = vld [vmem:[%s3348_s22 + $0x2c0] sm:$0xff] }
  0x3e   : > { %2909 = vmatprep.subr.bf16.mxu1 %v2908_v47  ;;  %648 = vmatmul.mubr.f32.vlgmr.msra.gmra.mrb[0].mxu0 %v3429_v53  ;;  %v539_v31 = vld [vmem:[%s3348_s22 + $0x330] sm:$0xff]  ;;  %v540_v33 = vld [vmem:[%s3348_s22 + $0x338] sm:$0xff]  ;;  %v526_v35 = vld [vmem:[%s3348_s22 + $0x2c8] sm:$0xff]  ;;  %v2890_v39 = vpack.c.bf16 %v508_v30, %v507_v29  ;;  %v3561_v29 = vshrl.u32 %v1028_v21, 7 }
  0x3f   : > { %2879 = vmatpush3.bf16.msra.mxu0 %v2878_v54  ;;  %652 = vmatprep.mubr.f32.mxu0 %v3446_v6  ;;  %v557_v36 = vld [vmem:[%s3348_s22 + $0x3c0] sm:$0xff]  ;;  %v558_v37 = vld [vmem:[%s3348_s22 + $0x3c8] sm:$0xff]  ;;  %v3503_v40 = vld [vmem:[%s4192_s3 + $0xd8] sm:$0xff]  ;;  %v2922_v43 = vpack.c.bf16 %v540_v33, %v539_v31  ;;  %v2892_v44 = vpack.c.bf16 %v526_v35, %v525_v34 }
  0x40   : > { %733 = vmatmul.mubr.f32.vlgmr.msra.gmra.mrb[0].mxu1 %v383_v55  ;;  %2881 = vmatprep.subr.bf16.mxu0 %v2880_v57  ;;  %v3498_v38 = vld [vmem:[%s4192_s3 + $0xe0] sm:$0xff]  ;;  %v411_v41 = vld [vmem:[%s4192_s3 + $0xf0] sm:$0xff]  ;;  %v410_v42 = vld [vmem:[%s4192_s3 + $0xe8] sm:$0xff]  ;;  %v2924_v48 = vpack.c.bf16 %v558_v37, %v557_v36 }
  0x41   : > { %2911 = vmatpush3.bf16.msra.mxu1 %v2910_v56  ;;  %737 = vmatprep.mubr.f32.mxu1 %v393_v9  ;;  %v509_v45 = vld [vmem:[%s3348_s22 + $0x240] sm:$0xff]  ;;  %v510_v46 = vld [vmem:[%s3348_s22 + $0x248] sm:$0xff]  ;;  %v527_v50 = vld [vmem:[%s3348_s22 + $0x2d0] sm:$0xff] }
  0x42   : > { %2913 = vmatprep.subr.bf16.mxu1 %v2912_v61  ;;  %653 = vmatmul.mubr.f32.gmra.mrb[2].mxu0 %v3451_v8  ;;  %v541_v47 = vld [vmem:[%s3348_s22 + $0x340] sm:$0xff]  ;;  %v542_v49 = vld [vmem:[%s3348_s22 + $0x348] sm:$0xff]  ;;  %v528_v51 = vld [vmem:[%s3348_s22 + $0x2d8] sm:$0xff]  ;;  %v2894_v56 = vpack.c.bf16 %v510_v46, %v509_v45 }
  0x43   : > { %2883 = vmatpush3.bf16.msra.mxu0 %v2882_v7  ;;  %657 = vmatprep.mubr.f32.mxu0 %v3472_v22  ;;  %v559_v52 = vld [vmem:[%s3348_s22 + $0x3d0] sm:$0xff]  ;;  %v560_v54 = vld [vmem:[%s3348_s22 + $0x3d8] sm:$0xff]  ;;  %v3524_v55 = vld [vmem:[%s4192_s3 + $0x28] sm:$0xff]  ;;  %v2926_v59 = vpack.c.bf16 %v542_v49, %v541_v47  ;;  %v2896_v60 = vpack.c.bf16 %v528_v51, %v527_v50 }
  0x44   : > { %738 = vmatmul.mubr.f32.gmra.mrb[2].mxu1 %v392_v10  ;;  %2885 = vmatprep.subr.bf16.mxu0 %v2884_v12  ;;  %v388_v57 = vld [vmem:[%s4192_s3 + $0x38] sm:$0xff]  ;;  %v3532_v58 = vld [vmem:[%s4193_s4 + $0x8] sm:$0xff]  ;;  %v511_v61 = vld [vmem:[%s3348_s22 + $0x250] sm:$0xff]  ;;  %v2928_v1 = vpack.c.bf16 %v560_v54, %v559_v52 }
  0x45   : > { %2915 = vmatpush3.bf16.msra.mxu1 %v2914_v11  ;;  %742 = vmatprep.mubr.f32.mxu1 %v402_v25  ;;  %v512_v62 = vld [vmem:[%s3348_s22 + $0x258] sm:$0xff]  ;;  %v543_v63 = vld [vmem:[%s3348_s22 + $0x350] sm:$0xff]  ;;  %v529_v5 = vld [vmem:[%s3348_s22 + $0x2e0] sm:$0xff] }
  0x46   : > { %2917 = vmatprep.subr.bf16.mxu1 %v2916_v16  ;;  %658 = vmatmul.mubr.f32.gmra.mrb[4].mxu0 %v3477_v24  ;;  %v544_v4 = vld [vmem:[%s3348_s22 + $0x358] sm:$0xff]  ;;  %v530_v7 = vld [vmem:[%s3348_s22 + $0x2e8] sm:$0xff]  ;;  %v561_v9 = vld [vmem:[%s3348_s22 + $0x3e0] sm:$0xff]  ;;  %v2898_v11 = vpack.c.bf16 %v512_v62, %v511_v61 }
  0x47   : > { %2887 = vmatpush3.bf16.msra.mxu0 %v2886_v23  ;;  %662 = vmatprep.mubr.f32.mxu0 %v3498_v38  ;;  %v562_v10 = vld [vmem:[%s3348_s22 + $0x3e8] sm:$0xff]  ;;  %v2930_v12 = vpack.c.bf16 %v544_v4, %v543_v63  ;;  %v2900_v13 = vpack.c.bf16 %v530_v7, %v529_v5  ;;  %v513_v14 = vld [vmem:[%s3348_s22 + $0x260] sm:$0xff]  ;;  %v531_v19 = vld [vmem:[%s3348_s22 + $0x2f0] sm:$0xff] }
  0x48   : > { %743 = vmatmul.mubr.f32.gmra.mrb[4].mxu1 %v401_v26  ;;  %2889 = vmatprep.subr.bf16.mxu0 %v2888_v28  ;;  %v514_v15 = vld [vmem:[%s3348_s22 + $0x268] sm:$0xff]  ;;  %v545_v16 = vld [vmem:[%s3348_s22 + $0x360] sm:$0xff]  ;;  %v2932_v17 = vpack.c.bf16 %v562_v10, %v561_v9  ;;  %v532_v20 = vld [vmem:[%s3348_s22 + $0x2f8] sm:$0xff]  ;;  %v3215_v26 = vmov 1  }
  0x49   : > { %2919 = vmatpush3.bf16.msra.mxu1 %v2918_v27  ;;  %747 = vmatprep.mubr.f32.mxu1 %v411_v41  ;;  %v546_v18 = vld [vmem:[%s3348_s22 + $0x368] sm:$0xff]  ;;  %v563_v23 = vld [vmem:[%s3348_s22 + $0x3f0] sm:$0xff]  ;;  %v564_v25 = vld [vmem:[%s3348_s22 + $0x3f8] sm:$0xff]  ;;  %v2902_v27 = vpack.c.bf16 %v514_v15, %v513_v14  ;;  %v2904_v31 = vpack.c.bf16 %v532_v20, %v531_v19  ;;  %v1054_v41 = vsub.s32 1, %v3561_v29 }
  0x4a   : > { %2921 = vmatprep.subr.bf16.mxu1 %v2920_v32  ;;  %663 = vmatmul.mubr.f32.gmra.mrb[6].mxu0 %v3503_v40  ;;  %v515_v28 = vld [vmem:[%s3348_s22 + $0x270] sm:$0xff]  ;;  %v2934_v30 = vpack.c.bf16 %v546_v18, %v545_v16  ;;  %v516_v32 = vld [vmem:[%s3348_s22 + $0x278] sm:$0xff]  ;;  %v3567_v33 = vld [vmem:[%s4193_s4] sm:$0xff]  ;;  %v2936_v35 = vpack.c.bf16 %v564_v25, %v563_v23  ;;  %v1082_v16 = vsub.s32 2, %v3561_v29 }
  0x4b   : > { %2891 = vmatpush3.bf16.msra.mxu0 %v2890_v39  ;;  %817 = vmatprep.mubr.f32.mxu0 %v3524_v55  ;;  %v3570_v34 = vld [vmem:[%s3551_s23 + $0x4] sm:$0x7]  ;;  %v547_v36 = vld [vmem:[%s3348_s22 + $0x370] sm:$0xff]  ;;  %v548_v37 = vld [vmem:[%s3348_s22 + $0x378] sm:$0xff]  ;;  %v1030_v39 = vsub.s32 0, %v3561_v29 }
  0x4c   : > { %748 = vmatmul.mubr.f32.gmra.mrb[6].mxu1 %v410_v42  ;;  %2893 = vmatprep.subr.bf16.mxu0 %v2892_v44  ;;  %v2906_v42 = vpack.c.bf16 %v516_v32, %v515_v28  ;;  %v2938_v44 = vpack.c.bf16 %v548_v37, %v547_v36  ;;  %v3585_v45 = vrot.slane %v3570_v34, %v1054_v41  ;;  %v565_v46 = vld [vmem:[%s3348_s22 + $0x400] sm:$0x7]  ;;  %v387_v49 = vld [vmem:[%s4192_s3 + $0x30] sm:$0xff]  ;;  %v3612_v52 = vld [vmem:[%s4192_s3 + $0x68] sm:$0xff]  ;;  %v3217_v28 = vmov 0.0  }
  0x4d   : > { %2923 = vmatpush3.bf16.msra.mxu1 %v2922_v43  ;;  %902 = vmatprep.mubr.f32.mxu1 %v388_v57  ;;  %v3580_v43 = vrot.slane %v3570_v34, %v1030_v39  ;;  %v3591_v47 = vld [vmem:[%s4192_s3 + $0x20] sm:$0xff]  ;;  %v3600_v50 = vld [vmem:[%s4192_s3 + $0x70] sm:$0xff]  ;;  %v396_v54 = vld [vmem:[%s4192_s3 + $0x78] sm:$0xff] }
  0x4e   : > { %2925 = vmatprep.subr.bf16.mxu1 %v2924_v48  ;;  %1015 = vperm.xlu1 %3115, %v3532_v58   ;;  %v4199_v48 = vmov 2   ;;  %v397_v51 = vld [vmem:[%s4192_s3 + $0x80] sm:$0xff]  ;;  %v406_v57 = vld [vmem:[%s4192_s3 + $0xc8] sm:$0xff]  ;;  %v415_v62 = vld [vmem:[%s4192_s3 + $0x110] sm:$0xff] }
  0x4f   : > { %2895 = vmatpush3.bf16.msra.mxu0 %v2894_v56  ;;  %v3620_v56 = vld [vmem:[%s4192_s3 + $0xb8] sm:$0xff]  ;;  %v3643_v61 = vld [vmem:[%s4192_s3 + $0x100] sm:$0xff]  ;;  %v414_v4 = vld [vmem:[%s4192_s3 + $0x108] sm:$0xff] }
  0x50   : > { %2897 = vmatprep.subr.bf16.mxu0 %v2896_v60  ;;  %v405_v60 = vld [vmem:[%s4192_s3 + $0xc0] sm:$0xff]  ;;  %v3670_v7 = vld [vmem:[%s4192_s3 + $0x88] sm:$0xff]  ;;  %v3678_v10 = vld [vmem:[%s4192_s3 + $0xd0] sm:$0xff] }
  0x51   : > { %2927 = vmatpush3.bf16.msra.mxu1 %v2926_v59  ;;  %v422_v59 = vld [vmem:[%s4194_s5 + $0x8] sm:$0xff]  ;;  %v3662_v5 = vld [vmem:[%s4192_s3 + $0x40] sm:$0xff]  ;;  %v3717_v21 = vld [vmem:[%s4193_s4 + $0x10] sm:$0xff] }
  0x52   : > { %2929 = vmatprep.subr.bf16.mxu1 %v2928_v1  ;;  %3116 = vset.pattern.permute.xlu1 %v3215_v26  ;;  %v1117_v63 = vsub.f32 1.0, %v422_v59  ;;  %v3654_v1 = vld [vmem:[%s4192_s3 + $0xf8] sm:$0xff]  ;;  %v421_v9 = vld [vmem:[%s4194_s5] sm:$0xff] }
  0x53   : > { %2899 = vmatpush3.bf16.msra.mxu0 %v2898_v11  ;;  %1041 = vperm.xlu1 %3116, %v3532_v58   ;;  %v1116_v11 = vsub.f32 1.0, %v421_v9  ;;  %v425_v14 = vld [vmem:[%s4195_s6] sm:$0xff]  ;;  %v3733_v25 = vld [vmem:[%s4194_s5 + $0x18] sm:$0xff] }
  0x54   : > { %2901 = vmatprep.subr.bf16.mxu0 %v2900_v13  ;;  %v426_v13 = vld [vmem:[%s4195_s6 + $0x8] sm:$0xff]  ;;  %v432_v15 = vld [vmem:[%s4197_s8] sm:$0xff] }
  0x55   : > { %2931 = vmatpush3.bf16.msra.mxu1 %v2930_v12  ;;  %v3687_v12 = vld [vmem:[%s4192_s3 + $0x118] sm:$0xff] }
  0x56   : > { %2933 = vmatprep.subr.bf16.mxu1 %v2932_v17  ;;  %v3706_v17 = vrot.slane %v3570_v34, %v1082_v16 }
  0x57   : > { %2903 = vmatpush3.bf16.msra.mxu0 %v2902_v27  ;;  %1037 = vperm.xlu1 %3116, %v3567_v33  }
  0x58   : > { %2905 = vmatprep.subr.bf16.mxu0 %v2904_v31 }
  0x59   : > { %2935 = vmatpush3.bf16.msra.mxu1 %v2934_v30 }
  0x5a   : > { %2937 = vmatprep.subr.bf16.mxu1 %v2936_v35 }
  0x5b   : > { %2907 = vmatpush3.bf16.msra.mxu0 %v2906_v42  ;;  %3118 = vset.pattern.permute.xlu1 %v4199_v48 }
  0x5c   : > { %2776 = vmatprep.subr.msk.mxu0 %vm579_vm0, %v565_v46  ;;  %1069 = vperm.xlu1 %3118, %v3532_v58   ;;  %v3632_v58 = vld [vmem:[%s4192_s3 + $0xb0] sm:$0xff] }
  0x5d   : > { %2939 = vmatpush3.bf16.msra.mxu1 %v2938_v44 }
  0x5e   : > { %818 = vmatmul.mubr.f32.vlgmr.msra.gmra.mrb[8].mxu0 %v3591_v47  ;;  %2784 = vmatprep.subr.mxu1 %v3217_v28 }
  0x5f   : > { %822 = vmatprep.mubr.f32.mxu0 %v3600_v50  ;;  %2777 = vmatpush3.msk.msra.mxu0 %vm579_vm0, %v565_v46 }
  0x60   : > { %903 = vmatmul.mubr.f32.vlgmr.msra.gmra.mrb[8].mxu1 %v387_v49  ;;  %1065 = vperm.xlu1 %3118, %v3567_v33  }
  0x61   : > { %907 = vmatprep.mubr.f32.mxu1 %v397_v51 }
  0x62   : > { %823 = vmatmul.mubr.f32.gmra.mrb[10].mxu0 %v3612_v52 }
  0x63   : > { %827 = vmatprep.mubr.f32.mxu0 %v3620_v56 }
  0x64   : > { %908 = vmatmul.mubr.f32.gmra.mrb[10].mxu1 %v396_v54  ;;  %3119 = vset.pattern.permute.xlu1 %v4200_v2 }
  0x65   : > { %912 = vmatprep.mubr.f32.mxu1 %v406_v57  ;;  %1099 = vperm.xlu1 %3119, %v422_v59  }
  0x66   : > { %828 = vmatmul.mubr.f32.gmra.mrb[12].mxu0 %v3632_v58 }
  0x67   : > { %832 = vmatprep.mubr.f32.mxu0 %v3643_v61 }
  0x68   : > { %913 = vmatmul.mubr.f32.gmra.mrb[12].mxu1 %v405_v60 }
  0x69   : > { %917 = vmatprep.mubr.f32.mxu1 %v415_v62  ;;  %1127 = vperm.xlu1 %3119, %v1117_v63  }
  0x6a   : > { %833 = vmatmul.mubr.f32.gmra.mrb[14].mxu0 %v3654_v1 }
  0x6b   : > { %2778 = vmatprep.mubr.msk.f32.mxu0 %vm566_vm1, %v3662_v5 }
  0x6c   : > { %918 = vmatmul.mubr.f32.gmra.mrb[14].mxu1 %v414_v4 }
  0x6d   : > { %1094 = vperm.xlu1 %3119, %v421_v9   ;;  %2786 = vmatprep.mubr.msk.f32.mxu1 %vm3218_vm2, %v3217_v28 }
  0x6e   : > { %2779 = vmatmul.mubr.msk.f32.vlgmr.msra.gmra.mrb[16].mxu0 %vm566_vm1, %v3670_v7 }
  0x6f   : > { %2781 = vmatprep.mubr.msk.f32.mxu0 %vm566_vm1, %v3678_v10 }
  0x71   : > { %1122 = vperm.xlu1 %3119, %v1116_v11  }
  0x72   : > { %2782 = vmatmul.mubr.msk.f32.gmra.mrb[18].mxu0 %vm566_vm1, %v3687_v12 }
  0x73   : > { %1561 = vmatprep.mubr.f32.mxu0 %v3324_v0 }
  0x75   : > { %1155 = vperm.xlu1 %3119, %v426_v13  }
  0x79   : > { %1150 = vperm.xlu1 %3119, %v425_v14  }
  0x7d   : > { %1189 = vperm.xlu1 %3119, %v432_v15  }
  0x81   : > { %3120 = vset.pattern.permute.xlu1 %v3215_v26 }
  0xa8   : > { %v1173_v0 = vpop.xlane.xlu0 %1172 }
  0xa9   : > { %v1175_v18 = vmul.f32 0.0078125, %v1173_v0 }
  0xab   : > { %v3709_v19 = vsub.f32 %v3342_v3, %v1175_v18  ;;  %v3724_v3 = vld [vmem:[%s4193_s4 + $0x18] sm:$0xff] }
  0xad   : > { %v1177_v20 = vmul.f32 %v3709_v19, %v3709_v19 }
  0xaf   : > { %1178 = vadd.xlane.f32.xlu0 %v1177_v20 }
  0xc5   : > { %1010 = vperm.xlu0 %3117, %v3567_v33  }
  0xc9   : > { %3122 = vset.pattern.permute.xlu0 %v3215_v26 }
  0xca   : > { %1045 = vperm.xlu0 %3122, %v3717_v21  }
  0xcd   : > { %v3728_v23 = vpop.permute.xlu1 %1015 }
  0xce   : > { %3123 = vset.pattern.permute.xlu0 %v4200_v2  ;;  %v1927_v26 = vmul.f32 %v3580_v43, %v3728_v23 }
  0xcf   : > { %1025 = vperm.xlu0 %3123, %v3724_v3  }
  0xd2   : > { %v1042_v27 = vpop.permute.xlu1 %1041 }
  0xd3   : > { %1109 = vperm.xlu0 %3123, %v3733_v25   ;;  %v1935_v30 = vmul.f32 %v3585_v45, %v1042_v27 }
  0xd5   : > { %v1939_v31 = vadd.f32 %v1935_v30, %v1927_v26 }
  0xd6   : > { %v3742_v32 = vpop.permute.xlu1 %1037 }
  0xdb   : > { %v3744_v33 = vpop.permute.xlu1 %1069 }
  0xdc   : > { %v1947_v34 = vmul.f32 %v3706_v17, %v3744_v33 }
  0xde   : > { %v1951_v35 = vadd.f32 %v1947_v34, %v1939_v31 }
  0xdf   : > { %v3748_v36 = vpop.permute.xlu1 %1065 }
  0xe4   : > { %v3750_v37 = vpop.permute.xlu1 %1099 }
  0xe8   : > { %v3752_v42 = vpop.permute.xlu1 %1127 }
  0xe9   : > { %v3755_v44 = vmul.f32 %v1951_v35, %v3752_v42 }
 0x111   : > { %v2438_v46 = vpop.f32.mrb[0].mxu0 }
 0x112   : > { %v2439_v51 = vpop.f32.mrb[1].mxu0 }
 0x113   : > { %v2482_v49 = vpop.f32.mrb[0].mxu1  ;;  %v2440_v54 = vadd.f32 %v2439_v51, %v2438_v46 }
 0x114   : > { %v2483_v57 = vpop.f32.mrb[1].mxu1 }
 0x115   : > { %v2484_v59 = vadd.f32 %v2483_v57, %v2482_v49  ;;  %v2441_v60 = vpop.f32.mrb[2].mxu0 }
 0x116   : > { %v2442_v4 = vpop.f32.mrb[3].mxu0 }
 0x117   : > { %v735_v62 = vadd.f32 %v2484_v59, %v2440_v54  ;;  %v2485_v63 = vpop.f32.mrb[2].mxu1  ;;  %v2443_v9 = vadd.f32 %v2442_v4, %v2441_v60  ;;  %v436_v60 = vld [vmem:[%s3551_s23] sm:$0x7] }
 0x118   : > { %v2486_v11 = vpop.f32.mrb[3].mxu1 }
 0x119   : > { %v2487_v13 = vadd.f32 %v2486_v11, %v2485_v63  ;;  %v2444_v14 = vpop.f32.mrb[4].mxu0 }
 0x11a   : > { %v2445_v18 = vpop.f32.mrb[5].mxu0 }
 0x11b   : > { %v740_v15 = vadd.f32 %v2487_v13, %v2443_v9  ;;  %v2488_v0 = vpop.f32.mrb[4].mxu1  ;;  %v2446_v20 = vadd.f32 %v2445_v18, %v2444_v14  ;;  %v3760_v13 = vrot.slane %v436_v60, %v1030_v39  ;;  %v3764_v14 = vrot.slane %v436_v60, %v1054_v41 }
 0x11c   : > { %v2489_v26 = vpop.f32.mrb[5].mxu1  ;;  %v3771_v39 = vrot.slane %v436_v60, %v1082_v16 }
 0x11d   : > { %v2490_v30 = vadd.f32 %v2489_v26, %v2488_v0  ;;  %v2447_v31 = vpop.f32.mrb[6].mxu0 }
 0x11e   : > { %v2448_v35 = vpop.f32.mrb[7].mxu0 }
 0x11f   : > { %v745_v34 = vadd.f32 %v2490_v30, %v2446_v20  ;;  %v2491_v46 = vpop.f32.mrb[6].mxu1  ;;  %v2449_v49 = vadd.f32 %v2448_v35, %v2447_v31 }
 0x120   : > { %v2492_v51 = vpop.f32.mrb[7].mxu1 }
 0x121   : > { %v2493_v54 = vadd.f32 %v2492_v51, %v2491_v46  ;;  %v3773_v51 = vpop.permute.xlu1 %1094 }
 0x123   : > { %v750_v57 = vadd.f32 %v2493_v54, %v2449_v49  ;;  %v1033_v49 = vmul.f32 %v3760_v13, %v3728_v23  ;;  %v1085_v23 = vmul.f32 %v3771_v39, %v3744_v33  ;;  %v1934_v33 = vmul.f32 %v3585_v45, %v3742_v32 }
 0x125   : > { %v3777_v2 = vpop.permute.xlu1 %1122 }
 0x131   : > { %v2526_v59 = vpop.f32.mrb[8].mxu0 }
 0x132   : > { %v2527_v4 = vpop.f32.mrb[9].mxu0 }
 0x133   : > { %v2570_v63 = vpop.f32.mrb[8].mxu1  ;;  %v2528_v11 = vadd.f32 %v2527_v4, %v2526_v59 }
 0x134   : > { %v2571_v48 = vpop.f32.mrb[9].mxu1 }
 0x135   : > { %v2572_v9 = vadd.f32 %v2571_v48, %v2570_v63  ;;  %v820_v0 = vadd.f32 %v2528_v11, %v735_v62  ;;  %v2529_v18 = vpop.f32.mrb[10].mxu0  ;;  %v1057_v48 = vmul.f32 %v3764_v14, %v1042_v27 }
 0x136   : > { %v2530_v20 = vpop.f32.mrb[11].mxu0 }
 0x137   : > { %v2573_v26 = vpop.f32.mrb[10].mxu1  ;;  %v2531_v30 = vadd.f32 %v2530_v20, %v2529_v18  ;;  %v905_v35 = vadd.f32 %v2572_v9, %v820_v0  ;;  %v1061_v20 = vadd.f32 %v1057_v48, %v1033_v49  ;;  %v1056_v49 = vmul.f32 %v3764_v14, %v3742_v32 }
 0x138   : > { %v2574_v31 = vpop.f32.mrb[11].mxu1 }
 0x139   : > { %v2575_v46 = vadd.f32 %v2574_v31, %v2573_v26  ;;  %v825_v41 = vadd.f32 %v2531_v30, %v740_v15  ;;  %v2532_v62 = vpop.f32.mrb[12].mxu0 }
 0x13a   : > { %v2533_v54 = vpop.f32.mrb[13].mxu0 }
 0x13b   : > { %v2576_v59 = vpop.f32.mrb[12].mxu1  ;;  %v2534_v4 = vadd.f32 %v2533_v54, %v2532_v62  ;;  %v910_v9 = vadd.f32 %v2575_v46, %v825_v41  ;;  %v1089_v54 = vadd.f32 %v1085_v23, %v1061_v20  ;;  %v1946_v20 = vmul.f32 %v3706_v17, %v3748_v36 }
 0x13c   : > { %v2577_v63 = vpop.f32.mrb[13].mxu1  ;;  %v1179_v11 = vpop.xlane.xlu0 %1178 }
 0x13d   : > { %v2578_v0 = vadd.f32 %v2577_v63, %v2576_v59  ;;  %v1180_v18 = vmul.f32 0.0078125, %v1179_v11  ;;  %v830_v27 = vadd.f32 %v2534_v4, %v745_v34  ;;  %v2535_v29 = vpop.f32.mrb[14].mxu0  ;;  %v1141_v23 = vmul.f32 %v3752_v42, %v1089_v54 }
 0x13e   : > { %v2536_v60 = vpop.f32.mrb[15].mxu0 }
 0x13f   : > { %v1181_v16 = vadd.f32 1e-05, %v1180_v18  ;;  %v2579_v26 = vpop.f32.mrb[14].mxu1  ;;  %v2537_v31 = vadd.f32 %v2536_v60, %v2535_v29  ;;  %v915_v30 = vadd.f32 %v2578_v0, %v830_v27  ;;  %v1084_v18 = vmul.f32 %v3771_v39, %v3748_v36  ;;  %v3791_v29 = vpop.permute.xlu1 %1155 }
 0x140   : > { %v2580_v15 = vpop.f32.mrb[15].mxu1 }
 0x141   : > { %3126 = vrsqrt.f32 %v1181_v16  ;;  %v2581_v62 = vadd.f32 %v2580_v15, %v2579_v26  ;;  %v835_v46 = vadd.f32 %v2537_v31, %v750_v57  ;;  %v2780_v41 = vpop.f32.mrb[16].mxu0 }
 0x142   : > { %v995_v34 = vadd.f32 %v2780_v41, %v910_v9  ;;  %v989_v48 = vpop.f32.mrb[17].mxu0 }
 0x143   : > { %v990_v4 = vadd.f32 %v989_v48, %v905_v35  ;;  %v920_v0 = vadd.f32 %v2581_v62, %v835_v46 }
 0x144   : > { %v1011_v59 = vpop.permute.xlu0 %1010  ;;  %v1113_v57 = vmul.f32 %v3750_v37, %v995_v34 }
 0x145   : > { %v1032_v63 = vmul.f32 %v3760_v13, %v1011_v59  ;;  %v1926_v11 = vmul.f32 %v3580_v43, %v1011_v59  ;;  %v2783_v27 = vpop.f32.mrb[18].mxu0  ;;  %v1112_v62 = vmul.f32 %v3773_v51, %v990_v4 }
 0x146   : > { %v3793_v35 = vadd.f32 %v2783_v27, %v920_v0  ;;  %v999_v16 = vpop.f32.mrb[19].mxu0  ;;  %v1145_v60 = vadd.f32 %v1141_v23, %v1113_v57  ;;  %v4206_v57 = vmov 0   ;;  %v1119_v23 = vsub.f32 1.0, %v3733_v25  ;;  %v2280_v27 = vld [vmem:[%s3348_s22 + $0x490] sm:$0xff] }
 0x147   : > { %v1060_v32 = vadd.f32 %v1056_v49, %v1032_v63  ;;  %v1938_v9 = vadd.f32 %v1934_v33, %v1926_v11  ;;  %v3797_v15 = vadd.f32 %v999_v16, %v915_v30  ;;  %v3803_v49 = vpop.permute.xlu1 %1150  ;;  %v3809_v30 = vld [vmem:[%s4196_s7] sm:$0xff]  ;;  %v2264_v25 = vld [vmem:[%s3348_s22 + $0x410] sm:$0xff] }
 0x148   : > { %v1169_v42 = vadd.f32 %v3791_v29, %v1145_v60  ;;  %v2281_v60 = vld [vmem:[%s3348_s22 + $0x498] sm:$0xff] }
 0x149   : > { %v1088_v26 = vadd.f32 %v1084_v18, %v1060_v32  ;;  %v3795_v31 = vadd.f32 %v1946_v20, %v1938_v9  ;;  %v4207_v20 = vmov 2   ;;  %v428_v32 = vld [vmem:[%s4195_s6 + $0x18] sm:$0xff]  ;;  %v3837_v9 = vld [vmem:[%s3338_s29 + $0x8] sm:$0xff] }
 0x14b   : > { %v1140_v36 = vmul.f32 %v3777_v2, %v1088_v26  ;;  %v3127_v46 = vpop.eup %3126  ;;  %v3819_v63 = vpop.permute.xlu1 %1189  ;;  %v2282_v26 = vld [vmem:[%s3348_s22 + $0x4a0] sm:$0xff] }
 0x14c   : > { %v1183_v54 = vmul.f32 %v3127_v46, %v3709_v19  ;;  %v423_v19 = vld [vmem:[%s4194_s5 + $0x10] sm:$0xff]  ;;  %v2265_v46 = vld [vmem:[%s3348_s22 + $0x418] sm:$0xff] }
 0x14d   : > { %v1144_v41 = vadd.f32 %v1140_v36, %v1112_v62  ;;  %v1118_v4 = vsub.f32 1.0, %v423_v19  ;;  %v2944_v36 = vpack.c.bf16 %v2282_v26, %v2281_v60 }
 0x14e   : > { %v1184_v33 = vmul.f32 %v1183_v54, %v1169_v42  ;;  %v2266_v42 = vld [vmem:[%s3348_s22 + $0x420] sm:$0xff] }
 0x14f   : > { %v1168_v34 = vadd.f32 %v3803_v49, %v1144_v41  ;;  %1132 = vperm.xlu0 %3123, %v1118_v4   ;;  %v2946_v54 = vpack.c.bf16 %v2266_v42, %v2265_v46  ;;  %v1046_v41 = vpop.permute.xlu0 %1045 }
 0x151   : > { %v1185_v48 = vadd.f32 %v1184_v33, %v1168_v34 }
 0x153   : > { %v1186_v59 = vmax.f32 %v1185_v48, 0.0  ;;  %v1026_v48 = vpop.permute.xlu0 %1025 }
 0x155   : > { %2785 = vmatpush3.msra.mxu1 %v1186_v59  ;;  %v1929_v59 = vmul.f32 %v3580_v43, %v1026_v48 }
 0x156   : > { %2787 = vmatmul.mubr.msk.f32.vlgmr.msra.gmra.mrb[16].mxu1 %vm1192_vm3, %v3809_v30  ;;  %2789 = vmatprep.subr.mxu1 %v3217_v28 }
 0x157   : > { %2791 = vmatprep.mubr.msk.f32.mxu1 %vm3218_vm2, %v3217_v28 }
 0x229   : > { %v1262_v11 = vpop.f32.mrb[16].mxu1 }
 0x22a   : > { %v3822_v0 = vadd.f32 %v1262_v11, %v3819_v63  ;;  %v2788_v18 = vpop.f32.mrb[17].mxu1 }
 0x22c   : > { %1266 = vadd.xlane.f32.xlu1 %v3822_v0 }
 0x23d   : > { %1049 = vperm.xlu1 %3120, %v3724_v3  }
 0x241   : > { %3121 = vset.pattern.permute.xlu1 %v4206_v57 }
 0x242   : > { %1020 = vperm.xlu1 %3121, %v3717_v21  }
 0x246   : > { %3124 = vset.pattern.permute.xlu1 %v4207_v20 }
 0x247   : > { %1077 = vperm.xlu1 %3124, %v3724_v3   ;;  %v2279_v3 = vld [vmem:[%s3348_s22 + $0x488] sm:$0xff] }
 0x248   : > { %v2940_v16 = vpack.c.bf16 %v2280_v27, %v2279_v3 }
 0x24a   : > { %2941 = vmatprep.subr.bf16.mxu0 %v2940_v16  ;;  %v1058_v16 = vmul.f32 %v3764_v14, %v1046_v41 }
 0x24b   : > { %1073 = vperm.xlu1 %3124, %v3717_v21   ;;  %v2263_v21 = vld [vmem:[%s3348_s22 + $0x408] sm:$0xff] }
 0x24c   : > { %v2942_v62 = vpack.c.bf16 %v2264_v25, %v2263_v21 }
 0x24e   : > { %2943 = vmatpush3.bf16.msra.mxu0 %v2942_v62 }
 0x24f   : > { %3125 = vset.pattern.permute.xlu1 %v4206_v57  ;;  %2945 = vmatprep.subr.bf16.mxu0 %v2944_v36  ;;  %v1936_v57 = vmul.f32 %v3585_v45, %v1046_v41 }
 0x250   : > { %1137 = vperm.xlu1 %3125, %v1119_v23   ;;  %v1035_v23 = vmul.f32 %v3760_v13, %v1026_v48 }
 0x252   : > { %2947 = vmatpush3.bf16.msra.mxu0 %v2946_v54 }
 0x254   : > { %1104 = vperm.xlu1 %3125, %v423_v19  }
 0x258   : > { %1165 = vperm.xlu1 %3125, %v428_v32  }
 0x27c   : > { %1970 = vadd.xlane.f32.xlu1 %v3837_v9 }
 0x2b9   : > { %v1267_v33 = vpop.xlane.xlu1 %1266 }
 0x2ba   : > { %v1268_v34 = vmul.f32 0.0078125, %v1267_v33 }
 0x2bc   : > { %v3850_v19 = vsub.f32 %v3822_v0, %v1268_v34 }
 0x2bd   : > { %v1050_v4 = vpop.permute.xlu1 %1049 }
 0x2be   : > { %v1937_v11 = vmul.f32 %v3585_v45, %v1050_v4  ;;  %v1270_v18 = vmul.f32 %v3850_v19, %v3850_v19  ;;  %v1059_v32 = vmul.f32 %v3764_v14, %v1050_v4  ;;  %v2284_v4 = vld [vmem:[%s3348_s22 + $0x4b0] sm:$0xff] }
 0x2c0   : > { %v1941_v20 = vadd.f32 %v1937_v11, %v1929_v59  ;;  %1271 = vadd.xlane.f32.xlu0 %v1270_v18  ;;  %v1063_v25 = vadd.f32 %v1059_v32, %v1035_v23  ;;  %v2283_v59 = vld [vmem:[%s3348_s22 + $0x4a8] sm:$0xff] }
 0x2c1   : > { %v1021_v3 = vpop.permute.xlu1 %1020 }
 0x2c2   : > { %v1928_v27 = vmul.f32 %v3580_v43, %v1021_v3  ;;  %v1034_v60 = vmul.f32 %v3760_v13, %v1021_v3  ;;  %v3863_v43 = vpop.permute.xlu0 %1109 }
 0x2c3   : > { %v1115_v11 = vmul.f32 %v3863_v43, %v3793_v35 }
 0x2c4   : > { %v1940_v21 = vadd.f32 %v1936_v57, %v1928_v27  ;;  %v1062_v36 = vadd.f32 %v1058_v16, %v1034_v60  ;;  %v2285_v27 = vld [vmem:[%s3348_s22 + $0x4b8] sm:$0xff] }
 0x2c5   : > { %v2269_v16 = vld [vmem:[%s3348_s22 + $0x438] sm:$0xff] }
 0x2c6   : > { %v1078_v26 = vpop.permute.xlu1 %1077  ;;  %v3869_v48 = vpop.permute.xlu0 %1132 }
 0x2c7   : > { %v1087_v45 = vmul.f32 %v3771_v39, %v1078_v26  ;;  %v1949_v62 = vmul.f32 %v3706_v17, %v1078_v26  ;;  %v2270_v26 = vld [vmem:[%s3348_s22 + $0x440] sm:$0xff] }
 0x2c9   : > { %v1091_v46 = vadd.f32 %v1087_v45, %v1063_v25  ;;  %v1953_v42 = vadd.f32 %v1949_v62, %v1941_v20  ;;  %v2268_v20 = vld [vmem:[%s3348_s22 + $0x430] sm:$0xff]  ;;  %v2954_v62 = vpack.c.bf16 %v2270_v26, %v2269_v16  ;;  %v2294_v16 = vld [vmem:[%s3348_s22 + $0x500] sm:$0xff] }
 0x2ca   : > { %v1074_v54 = vpop.permute.xlu1 %1073  ;;  %v427_v25 = vld [vmem:[%s4195_s6 + $0x10] sm:$0xff]  ;;  %v2278_v26 = vld [vmem:[%s3348_s22 + $0x480] sm:$0xff] }
 0x2cb   : > { %v1086_v14 = vmul.f32 %v3771_v39, %v1074_v54  ;;  %v1948_v41 = vmul.f32 %v3706_v17, %v1074_v54  ;;  %v2948_v39 = vpack.c.bf16 %v2284_v4, %v2283_v59  ;;  %v2267_v17 = vld [vmem:[%s3348_s22 + $0x428] sm:$0xff]  ;;  %v2273_v4 = vld [vmem:[%s3348_s22 + $0x458] sm:$0xff] }
 0x2cc   : > { %v2950_v23 = vpack.c.bf16 %v2268_v20, %v2267_v17  ;;  %v2292_v17 = vld [vmem:[%s3348_s22 + $0x4f0] sm:$0xff] }
 0x2cd   : > { %v1090_v33 = vadd.f32 %v1086_v14, %v1062_v36  ;;  %v3867_v13 = vadd.f32 %v1948_v41, %v1940_v21  ;;  %2949 = vmatprep.subr.bf16.mxu0 %v2948_v39  ;;  %v2286_v21 = vld [vmem:[%s3348_s22 + $0x4c0] sm:$0xff]  ;;  %v2271_v14 = vld [vmem:[%s3348_s22 + $0x448] sm:$0xff]  ;;  %v2272_v41 = vld [vmem:[%s3348_s22 + $0x450] sm:$0xff] }
 0x2ce   : > { %2951 = vmatpush3.bf16.msra.mxu0 %v2950_v23  ;;  %v2952_v60 = vpack.c.bf16 %v2286_v21, %v2285_v27  ;;  %v2291_v39 = vld [vmem:[%s3348_s22 + $0x4e8] sm:$0xff]  ;;  %v2293_v21 = vld [vmem:[%s3348_s22 + $0x4f8] sm:$0xff] }
 0x2cf   : > { %v1138_v34 = vpop.permute.xlu1 %1137  ;;  %v1142_v32 = vmul.f32 %v3869_v48, %v1090_v33  ;;  %v2958_v33 = vpack.c.bf16 %v2272_v41, %v2271_v14  ;;  %v2964_v20 = vpack.c.bf16 %v2292_v17, %v2291_v39  ;;  %v2275_v23 = vld [vmem:[%s3348_s22 + $0x468] sm:$0xff]  ;;  %v2328_v14 = vld [vmem:[%s3348_s22 + $0x610] sm:$0xff] }
 0x2d0   : > { %v1143_v18 = vmul.f32 %v1138_v34, %v1091_v46  ;;  %v3875_v57 = vmul.f32 %v1953_v42, %v1138_v34  ;;  %2953 = vmatprep.subr.bf16.mxu0 %v2952_v60  ;;  %v2287_v46 = vld [vmem:[%s3348_s22 + $0x4c8] sm:$0xff]  ;;  %v2288_v42 = vld [vmem:[%s3348_s22 + $0x4d0] sm:$0xff]  ;;  %v2290_v34 = vld [vmem:[%s3348_s22 + $0x4e0] sm:$0xff] }
 0x2d1   : > { %v2956_v54 = vpack.c.bf16 %v2288_v42, %v2287_v46  ;;  %v2277_v60 = vld [vmem:[%s3348_s22 + $0x478] sm:$0xff]  ;;  %v2344_v46 = vld [vmem:[%s3348_s22 + $0x690] sm:$0xff]  ;;  %v2327_v42 = vld [vmem:[%s3348_s22 + $0x608] sm:$0xff] }
 0x2d2   : > { %v3880_v3 = vadd.f32 %v1143_v18, %v1115_v11  ;;  %2955 = vmatpush3.bf16.msra.mxu0 %v2954_v62  ;;  %v2274_v11 = vld [vmem:[%s3348_s22 + $0x460] sm:$0xff]  ;;  %v2343_v62 = vld [vmem:[%s3348_s22 + $0x688] sm:$0xff]  ;;  %v3006_v41 = vpack.c.bf16 %v2328_v14, %v2327_v42  ;;  %v2356_v14 = vld [vmem:[%s3348_s22 + $0x6f0] sm:$0xff] }
 0x2d3   : > { %v3885_v35 = vpop.permute.xlu1 %1104  ;;  %2957 = vmatprep.subr.bf16.mxu0 %v2956_v54  ;;  %v2962_v18 = vpack.c.bf16 %v2274_v11, %v2273_v4  ;;  %v3004_v54 = vpack.c.bf16 %v2344_v46, %v2343_v62  ;;  %v2330_v4 = vld [vmem:[%s3348_s22 + $0x620] sm:$0xff]  ;;  %v2331_v39 = vld [vmem:[%s3348_s22 + $0x628] sm:$0xff] }
 0x2d4   : > { %v1114_v45 = vmul.f32 %v3885_v35, %v3797_v15  ;;  %v2289_v15 = vld [vmem:[%s3348_s22 + $0x4d8] sm:$0xff]  ;;  %v2354_v62 = vld [vmem:[%s3348_s22 + $0x6e0] sm:$0xff] }
 0x2d5   : > { %v2960_v59 = vpack.c.bf16 %v2290_v34, %v2289_v15  ;;  %v2346_v15 = vld [vmem:[%s3348_s22 + $0x6a0] sm:$0xff]  ;;  %v2329_v34 = vld [vmem:[%s3348_s22 + $0x618] sm:$0xff] }
 0x2d6   : > { %1160 = vperm.xlu0 %3123, %v427_v25   ;;  %v3893_v36 = vadd.f32 %v1142_v32, %v1114_v45  ;;  %2959 = vmatpush3.bf16.msra.mxu0 %v2958_v33  ;;  %v2276_v32 = vld [vmem:[%s3348_s22 + $0x470] sm:$0xff]  ;;  %v2968_v25 = vpack.c.bf16 %v2294_v16, %v2293_v21  ;;  %v2970_v45 = vpack.c.bf16 %v2278_v26, %v2277_v60  ;;  %v2345_v33 = vld [vmem:[%s3348_s22 + $0x698] sm:$0xff]  ;;  %v2351_v16 = vld [vmem:[%s3348_s22 + $0x6c8] sm:$0xff] }
 0x2d7   : > { %2961 = vmatprep.subr.bf16.mxu0 %v2960_v59  ;;  %v2966_v27 = vpack.c.bf16 %v2276_v32, %v2275_v23  ;;  %v3008_v59 = vpack.c.bf16 %v2346_v15, %v2345_v33  ;;  %v3010_v11 = vpack.c.bf16 %v2330_v4, %v2329_v34  ;;  %v2349_v23 = vld [vmem:[%s3348_s22 + $0x6b8] sm:$0xff]  ;;  %v2336_v60 = vld [vmem:[%s3348_s22 + $0x650] sm:$0xff]  ;;  %v2338_v42 = vld [vmem:[%s3348_s22 + $0x660] sm:$0xff] }
 0x2d8   : > { %v2333_v32 = vld [vmem:[%s3348_s22 + $0x638] sm:$0xff]  ;;  %v2340_v15 = vld [vmem:[%s3348_s22 + $0x670] sm:$0xff]  ;;  %v2358_v4 = vld [vmem:[%s3348_s22 + $0x700] sm:$0xff] }
 0x2da   : > { %2963 = vmatpush3.bf16.msra.mxu0 %v2962_v18  ;;  %v2347_v18 = vld [vmem:[%s3348_s22 + $0x6a8] sm:$0xff] }
 0x2db   : > { %2965 = vmatprep.subr.bf16.mxu0 %v2964_v20  ;;  %v2332_v20 = vld [vmem:[%s3348_s22 + $0x630] sm:$0xff] }
 0x2de   : > { %2967 = vmatpush3.bf16.msra.mxu0 %v2966_v27 }
 0x2df   : > { %2969 = vmatprep.subr.bf16.mxu0 %v2968_v25  ;;  %v2335_v25 = vld [vmem:[%s3348_s22 + $0x648] sm:$0xff] }
 0x2e0   : > { %v3022_v26 = vpack.c.bf16 %v2336_v60, %v2335_v25  ;;  %v2298_v60 = vld [vmem:[%s3348_s22 + $0x520] sm:$0xff] }
 0x2e2   : > { %2971 = vmatpush3.bf16.msra.mxu0 %v2970_v45  ;;  %v2353_v45 = vld [vmem:[%s3348_s22 + $0x6d8] sm:$0xff] }
 0x2e3   : > { %3005 = vmatprep.subr.bf16.mxu0 %v3004_v54  ;;  %v3024_v46 = vpack.c.bf16 %v2354_v62, %v2353_v45  ;;  %v2316_v45 = vld [vmem:[%s3348_s22 + $0x5b0] sm:$0xff] }
 0x2e5   : > { %1562 = vmatmul.mubr.f32.vlgmr.msra.gmra.mrb[20].mxu0 %v3429_v53  ;;  %v2348_v53 = vld [vmem:[%s3348_s22 + $0x6b0] sm:$0xff] }
 0x2e6   : > { %3007 = vmatpush3.bf16.msra.mxu0 %v3006_v41  ;;  %1566 = vmatprep.mubr.f32.mxu0 %v3446_v6  ;;  %v3012_v17 = vpack.c.bf16 %v2348_v53, %v2347_v18  ;;  %v3014_v6 = vpack.c.bf16 %v2332_v20, %v2331_v39  ;;  %v2339_v41 = vld [vmem:[%s3348_s22 + $0x668] sm:$0xff]  ;;  %v2342_v53 = vld [vmem:[%s3348_s22 + $0x680] sm:$0xff]  ;;  %v3951_v39 = vpop.permute.xlu1 %1165 }
 0x2e7   : > { %3009 = vmatprep.subr.bf16.mxu0 %v3008_v59  ;;  %v3030_v34 = vpack.c.bf16 %v2340_v15, %v2339_v41  ;;  %v2357_v59 = vld [vmem:[%s3348_s22 + $0x6f8] sm:$0xff] }
 0x2e8   : > { %v3032_v18 = vpack.c.bf16 %v2358_v4, %v2357_v59  ;;  %v2301_v15 = vld [vmem:[%s3348_s22 + $0x538] sm:$0xff]  ;;  %v2319_v59 = vld [vmem:[%s3348_s22 + $0x5c8] sm:$0xff]  ;;  %v2320_v4 = vld [vmem:[%s3348_s22 + $0x5d0] sm:$0xff] }
 0x2e9   : > { %1567 = vmatmul.mubr.f32.gmra.mrb[22].mxu0 %v3451_v8  ;;  %v2350_v8 = vld [vmem:[%s3348_s22 + $0x6c0] sm:$0xff] }
 0x2ea   : > { %3011 = vmatpush3.bf16.msra.mxu0 %v3010_v11  ;;  %1571 = vmatprep.mubr.f32.mxu0 %v3472_v22  ;;  %v3016_v27 = vpack.c.bf16 %v2350_v8, %v2349_v23  ;;  %v2334_v22 = vld [vmem:[%s3348_s22 + $0x640] sm:$0xff]  ;;  %v2341_v11 = vld [vmem:[%s3348_s22 + $0x678] sm:$0xff] }
 0x2eb   : > { %3013 = vmatprep.subr.bf16.mxu0 %v3012_v17  ;;  %v3018_v21 = vpack.c.bf16 %v2334_v22, %v2333_v32  ;;  %v3034_v17 = vpack.c.bf16 %v2342_v53, %v2341_v11  ;;  %v2295_v32 = vld [vmem:[%s3348_s22 + $0x508] sm:$0xff] }
 0x2ec   : > { %v2303_v53 = vld [vmem:[%s3348_s22 + $0x548] sm:$0xff] }
 0x2ed   : > { %1572 = vmatmul.mubr.f32.gmra.mrb[24].mxu0 %v3477_v24  ;;  %v2352_v24 = vld [vmem:[%s3348_s22 + $0x6d0] sm:$0xff] }
 0x2ee   : > { %3015 = vmatpush3.bf16.msra.mxu0 %v3014_v6  ;;  %1576 = vmatprep.mubr.f32.mxu0 %v3498_v38  ;;  %v3020_v38 = vpack.c.bf16 %v2352_v24, %v2351_v16  ;;  %v2314_v16 = vld [vmem:[%s3348_s22 + $0x5a0] sm:$0xff] }
 0x2ef   : > { %3017 = vmatprep.subr.bf16.mxu0 %v3016_v27  ;;  %v2296_v27 = vld [vmem:[%s3348_s22 + $0x510] sm:$0xff] }
 0x2f1   : > { %1577 = vmatmul.mubr.f32.gmra.mrb[26].mxu0 %v3503_v40  ;;  %v2337_v40 = vld [vmem:[%s3348_s22 + $0x658] sm:$0xff] }
 0x2f2   : > { %3019 = vmatpush3.bf16.msra.mxu0 %v3018_v21  ;;  %1731 = vmatprep.mubr.f32.mxu0 %v3524_v55  ;;  %v3026_v54 = vpack.c.bf16 %v2338_v42, %v2337_v40  ;;  %v2355_v55 = vld [vmem:[%s3348_s22 + $0x6e8] sm:$0xff]  ;;  %v2313_v21 = vld [vmem:[%s3348_s22 + $0x598] sm:$0xff] }
 0x2f3   : > { %3021 = vmatprep.subr.bf16.mxu0 %v3020_v38  ;;  %v3028_v33 = vpack.c.bf16 %v2356_v14, %v2355_v55  ;;  %v2297_v38 = vld [vmem:[%s3348_s22 + $0x518] sm:$0xff]  ;;  %v2299_v42 = vld [vmem:[%s3348_s22 + $0x528] sm:$0xff]  ;;  %v2318_v14 = vld [vmem:[%s3348_s22 + $0x5c0] sm:$0xff] }
 0x2f4   : > { %v2978_v62 = vpack.c.bf16 %v2298_v60, %v2297_v38  ;;  %v3134_v40 = vld [vmem:[%s4192_s3 + $0x18] sm:$0xff]  ;;  %v2360_v38 = vld [vmem:[%s3348_s22 + $0x710] sm:$0xff] }
 0x2f5   : > { %v2317_v55 = vld [vmem:[%s3348_s22 + $0x5b8] sm:$0xff] }
 0x2f6   : > { %3023 = vmatpush3.bf16.msra.mxu0 %v3022_v26  ;;  %v2315_v26 = vld [vmem:[%s3348_s22 + $0x5a8] sm:$0xff]  ;;  %v2377_v60 = vld [vmem:[%s3348_s22 + $0x798] sm:$0xff] }
 0x2f7   : > { %3025 = vmatprep.subr.bf16.mxu0 %v3024_v46  ;;  %v2980_v46 = vpack.c.bf16 %v2316_v45, %v2315_v26  ;;  %v2378_v26 = vld [vmem:[%s3348_s22 + $0x7a0] sm:$0xff] }
 0x2fa   : > { %3027 = vmatpush3.bf16.msra.mxu0 %v3026_v54  ;;  %v2300_v54 = vld [vmem:[%s3348_s22 + $0x530] sm:$0xff] }
 0x2fb   : > { %3029 = vmatprep.subr.bf16.mxu0 %v3028_v33  ;;  %v2982_v41 = vpack.c.bf16 %v2300_v54, %v2299_v42  ;;  %v2984_v33 = vpack.c.bf16 %v2318_v14, %v2317_v55  ;;  %v2379_v42 = vld [vmem:[%s3348_s22 + $0x7a8] sm:$0xff]  ;;  %v2380_v54 = vld [vmem:[%s3348_s22 + $0x7b0] sm:$0xff] }
 0x2fc   : > { %v3135_v55 = vld [vmem:[%s4192_s3 + $0x10] sm:$0xff] }
 0x2fe   : > { %3031 = vmatpush3.bf16.msra.mxu0 %v3030_v34  ;;  %v2302_v34 = vld [vmem:[%s3348_s22 + $0x540] sm:$0xff] }
 0x2ff   : > { %3033 = vmatprep.subr.bf16.mxu0 %v3032_v18  ;;  %v2986_v11 = vpack.c.bf16 %v2302_v34, %v2301_v15  ;;  %v2988_v18 = vpack.c.bf16 %v2320_v4, %v2319_v59  ;;  %v2363_v15 = vld [vmem:[%s3348_s22 + $0x728] sm:$0xff]  ;;  %v2364_v34 = vld [vmem:[%s3348_s22 + $0x730] sm:$0xff]  ;;  %v2381_v59 = vld [vmem:[%s3348_s22 + $0x7b8] sm:$0xff] }
 0x300   : > { %v2382_v4 = vld [vmem:[%s3348_s22 + $0x7c0] sm:$0xff] }
 0x302   : > { %3035 = vmatpush3.bf16.msra.mxu0 %v3034_v17  ;;  %v2304_v17 = vld [vmem:[%s3348_s22 + $0x550] sm:$0xff] }
 0x305   : > { %1732 = vmatmul.mubr.f32.vlgmr.msra.gmra.mrb[28].mxu0 %v3591_v47  ;;  %v2391_v47 = vld [vmem:[%s3348_s22 + $0x808] sm:$0x7] }
 0x306   : > { %1736 = vmatprep.mubr.f32.mxu0 %v3600_v50  ;;  %2794 = vmatprep.subr.msk.mxu0 %vm579_vm0, %v2391_v47 }
 0x307   : > { %2795 = vmatpush3.msk.msra.mxu0 %vm579_vm0, %v2391_v47 }
 0x308   : > { %2807 = vmatprep.subr.mxu0 %v3217_v28 }
 0x309   : > { %v1971_v20 = vpop.xlane.xlu1 %1970  ;;  %1737 = vmatmul.mubr.f32.gmra.mrb[30].mxu0 %v3612_v52 }
 0x30a   : > { %v1972_v6 = vmul.f32 0.0078125, %v1971_v20  ;;  %1741 = vmatprep.mubr.f32.mxu0 %v3620_v56  ;;  %v2321_v20 = vld [vmem:[%s3348_s22 + $0x5d8] sm:$0xff] }
 0x30c   : > { %v3956_v23 = vsub.f32 %v3837_v9, %v1972_v6  ;;  %v2312_v9 = vld [vmem:[%s3348_s22 + $0x590] sm:$0xff]  ;;  %v2322_v6 = vld [vmem:[%s3348_s22 + $0x5e0] sm:$0xff] }
 0x30d   : > { %1742 = vmatmul.mubr.f32.gmra.mrb[32].mxu0 %v3632_v58  ;;  %v2992_v47 = vpack.c.bf16 %v2322_v6, %v2321_v20  ;;  %v2365_v20 = vld [vmem:[%s3348_s22 + $0x738] sm:$0xff]  ;;  %v2366_v6 = vld [vmem:[%s3348_s22 + $0x740] sm:$0xff] }
 0x30e   : > { %v1974_v8 = vmul.f32 %v3956_v23, %v3956_v23  ;;  %1746 = vmatprep.mubr.f32.mxu0 %v3643_v61 }
 0x310   : > { %1975 = vadd.xlane.f32.xlu0 %v1974_v8  ;;  %v2990_v8 = vpack.c.bf16 %v2304_v17, %v2303_v53  ;;  %v3138_v53 = vld [vmem:[%s4192_s3 + $0xa8] sm:$0xff]  ;;  %v3048_v17 = vpack.c.bf16 %v2382_v4, %v2381_v59 }
 0x311   : > { %1747 = vmatmul.mubr.f32.gmra.mrb[34].mxu0 %v3654_v1  ;;  %v1171_v1 = vadd.f32 %v3951_v39, %v3880_v3  ;;  %v2974_v3 = vpack.c.bf16 %v2296_v27, %v2295_v32 }
 0x312   : > { %2796 = vmatprep.mubr.msk.f32.mxu0 %vm566_vm1, %v3662_v5 }
 0x315   : > { %2797 = vmatmul.mubr.msk.f32.vlgmr.msra.gmra.mrb[36].mxu0 %vm566_vm1, %v3670_v7 }
 0x316   : > { %2799 = vmatprep.mubr.msk.f32.mxu0 %vm566_vm1, %v3678_v10 }
 0x319   : > { %2800 = vmatmul.mubr.msk.f32.gmra.mrb[38].mxu0 %vm566_vm1, %v3687_v12  ;;  %v2311_v12 = vld [vmem:[%s3348_s22 + $0x588] sm:$0xff] }
 0x31a   : > { %2809 = vmatprep.mubr.msk.f32.mxu0 %vm3218_vm2, %v3217_v28  ;;  %v2972_v24 = vpack.c.bf16 %v2312_v9, %v2311_v12  ;;  %v2325_v12 = vld [vmem:[%s3348_s22 + $0x5f8] sm:$0xff]  ;;  %v2326_v9 = vld [vmem:[%s3348_s22 + $0x600] sm:$0xff] }
 0x31b   : > { %v3000_v27 = vpack.c.bf16 %v2326_v9, %v2325_v12  ;;  %v3141_v12 = vld [vmem:[%s4192_s3 + $0xe8] sm:$0xff] }
 0x34d   : > { %v1272_v50 = vpop.xlane.xlu0 %1271 }
 0x34e   : > { %v1273_v52 = vmul.f32 0.0078125, %v1272_v50  ;;  %v2305_v50 = vld [vmem:[%s3348_s22 + $0x558] sm:$0xff] }
 0x350   : > { %v1274_v56 = vadd.f32 1e-05, %v1273_v52  ;;  %v2306_v52 = vld [vmem:[%s3348_s22 + $0x560] sm:$0xff] }
 0x352   : > { %3128 = vrsqrt.f32 %v1274_v56  ;;  %v2323_v56 = vld [vmem:[%s3348_s22 + $0x5e8] sm:$0xff] }
 0x355   : > { %v3979_v61 = vpop.permute.xlu0 %1160 }
 0x356   : > { %v1170_v10 = vadd.f32 %v3979_v61, %v3893_v36  ;;  %v2976_v36 = vpack.c.bf16 %v2314_v16, %v2313_v21  ;;  %v2310_v21 = vld [vmem:[%s3348_s22 + $0x580] sm:$0xff]  ;;  %v2375_v16 = vld [vmem:[%s3348_s22 + $0x788] sm:$0xff] }
 0x35c   : > { %v3129_v58 = vpop.eup %3128 }
 0x35d   : > { %v1276_v5 = vmul.f32 %v3129_v58, %v3850_v19  ;;  %v3995_v19 = vld [vmem:[%s4196_s7 + $0x8] sm:$0xff]  ;;  %v2324_v58 = vld [vmem:[%s3348_s22 + $0x5f0] sm:$0xff] }
 0x35f   : > { %v1277_v7 = vmul.f32 %v1276_v5, %v1171_v1  ;;  %v2994_v1 = vpack.c.bf16 %v2306_v52, %v2305_v50  ;;  %v2996_v5 = vpack.c.bf16 %v2324_v58, %v2323_v56  ;;  %v3139_v50 = vld [vmem:[%s4192_s3 + $0xa0] sm:$0xff]  ;;  %v3050_v52 = vpack.c.bf16 %v2366_v6, %v2365_v20  ;;  %v3140_v56 = vld [vmem:[%s4192_s3 + $0xf0] sm:$0xff] }
 0x361   : > { %v1278_v22 = vadd.f32 %v1277_v7, %v1170_v10  ;;  %v2307_v7 = vld [vmem:[%s3348_s22 + $0x568] sm:$0xff]  ;;  %v2308_v10 = vld [vmem:[%s3348_s22 + $0x570] sm:$0xff] }
 0x362   : > { %v2998_v32 = vpack.c.bf16 %v2308_v10, %v2307_v7  ;;  %v2385_v7 = vld [vmem:[%s3348_s22 + $0x7d8] sm:$0xff]  ;;  %v2386_v10 = vld [vmem:[%s3348_s22 + $0x7e0] sm:$0xff] }
 0x363   : > { %v1279_v25 = vmax.f32 %v1278_v22, 0.0  ;;  %v2309_v22 = vld [vmem:[%s3348_s22 + $0x578] sm:$0xff] }
 0x365   : > { %2790 = vmatpush3.msra.mxu1 %v1279_v25  ;;  %v3002_v25 = vpack.c.bf16 %v2310_v21, %v2309_v22  ;;  %v2369_v22 = vld [vmem:[%s3348_s22 + $0x758] sm:$0xff]  ;;  %v2370_v21 = vld [vmem:[%s3348_s22 + $0x760] sm:$0xff] }
 0x366   : > { %2792 = vmatmul.mubr.msk.f32.vlgmr.msra.gmra.mrb[18].mxu1 %vm1192_vm3, %v3995_v19  ;;  %2973 = vmatprep.subr.bf16.mxu1 %v2972_v24  ;;  %v2376_v24 = vld [vmem:[%s3348_s22 + $0x790] sm:$0xff] }
 0x367   : > { %2975 = vmatpush3.bf16.msra.mxu1 %v2974_v3  ;;  %1646 = vmatprep.mubr.f32.mxu1 %v3134_v40  ;;  %v3036_v3 = vpack.c.bf16 %v2376_v24, %v2375_v16  ;;  %v2361_v40 = vld [vmem:[%s3348_s22 + $0x718] sm:$0xff]  ;;  %v2387_v16 = vld [vmem:[%s3348_s22 + $0x7e8] sm:$0xff]  ;;  %v2388_v24 = vld [vmem:[%s3348_s22 + $0x7f0] sm:$0xff] }
 0x368   : > { %2977 = vmatprep.subr.bf16.mxu1 %v2976_v36  ;;  %v2359_v36 = vld [vmem:[%s3348_s22 + $0x708] sm:$0xff] }
 0x369   : > { %v3038_v45 = vpack.c.bf16 %v2360_v38, %v2359_v36  ;;  %v2371_v36 = vld [vmem:[%s3348_s22 + $0x768] sm:$0xff]  ;;  %v2372_v38 = vld [vmem:[%s3348_s22 + $0x770] sm:$0xff] }
 0x36b   : > { %2979 = vmatpush3.bf16.msra.mxu1 %v2978_v62  ;;  %v3040_v62 = vpack.c.bf16 %v2378_v26, %v2377_v60  ;;  %v2389_v60 = vld [vmem:[%s3348_s22 + $0x7f8] sm:$0xff]  ;;  %v2390_v26 = vld [vmem:[%s3348_s22 + $0x800] sm:$0xff] }
 0x36c   : > { %2981 = vmatprep.subr.bf16.mxu1 %v2980_v46  ;;  %v2362_v46 = vld [vmem:[%s3348_s22 + $0x720] sm:$0xff] }
 0x36d   : > { %v3042_v14 = vpack.c.bf16 %v2362_v46, %v2361_v40  ;;  %v2373_v40 = vld [vmem:[%s3348_s22 + $0x778] sm:$0xff]  ;;  %v2374_v46 = vld [vmem:[%s3348_s22 + $0x780] sm:$0xff] }
 0x36f   : > { %2983 = vmatpush3.bf16.msra.mxu1 %v2982_v41  ;;  %v3136_v41 = vld [vmem:[%s4192_s3 + $0x60] sm:$0xff] }
 0x370   : > { %2985 = vmatprep.subr.bf16.mxu1 %v2984_v33  ;;  %v3044_v33 = vpack.c.bf16 %v2380_v54, %v2379_v42  ;;  %v3066_v42 = vpack.c.bf16 %v2374_v46, %v2373_v40  ;;  %v3143_v54 = vld [vmem:[%s4192_s3 + $0x30] sm:$0xff] }
 0x373   : > { %2987 = vmatpush3.bf16.msra.mxu1 %v2986_v11  ;;  %v3137_v11 = vld [vmem:[%s4192_s3 + $0x58] sm:$0xff] }
 0x374   : > { %2989 = vmatprep.subr.bf16.mxu1 %v2988_v18  ;;  %v3046_v18 = vpack.c.bf16 %v2364_v34, %v2363_v15  ;;  %v3148_v15 = vld [vmem:[%s4192_s3 + $0x110] sm:$0xff]  ;;  %v3149_v34 = vld [vmem:[%s4192_s3 + $0x108] sm:$0xff] }
 0x377   : > { %2991 = vmatpush3.bf16.msra.mxu1 %v2990_v8  ;;  %v2383_v8 = vld [vmem:[%s3348_s22 + $0x7c8] sm:$0xff] }
 0x378   : > { %2993 = vmatprep.subr.bf16.mxu1 %v2992_v47  ;;  %v2384_v47 = vld [vmem:[%s3348_s22 + $0x7d0] sm:$0xff] }
 0x379   : > { %v3052_v58 = vpack.c.bf16 %v2384_v47, %v2383_v8 }
 0x37b   : > { %2995 = vmatpush3.bf16.msra.mxu1 %v2994_v1  ;;  %v2367_v1 = vld [vmem:[%s3348_s22 + $0x748] sm:$0xff] }
 0x37c   : > { %2997 = vmatprep.subr.bf16.mxu1 %v2996_v5  ;;  %v2368_v5 = vld [vmem:[%s3348_s22 + $0x750] sm:$0xff]  ;;  %s2155_s22 = sshll.u32 %s360_s27, 4  ;;  %s4139_s22 = int_to_ptr.vmem [resolvable:$true] %s2155_s22 }
 0x37d   : > { %v3054_v9 = vpack.c.bf16 %v2368_v5, %v2367_v1  ;;  %s3150_s21 = scalar_lea.vmem %s4139_s22, 256  ;;  %p3157_p0 = scmp.lt.s32.totalorder %s4139_s22, %s3155_s17 }
 0x37e   : > { %p3151_p11 = scmp.ne.s32.totalorder %s4139_s22, %s3150_s21  ;;  %p3158_p1 = scmp.lt.s32.totalorder %s3156_s24, %s3150_s21 }
 0x37f   : > { %2999 = vmatpush3.bf16.msra.mxu1 %v2998_v32  ;;  %v3142_v32 = vld [vmem:[%s4192_s3 + $0x38] sm:$0xff] }
 0x380   : > { %3001 = vmatprep.subr.bf16.mxu1 %v3000_v27  ;;  %v3056_v27 = vpack.c.bf16 %v2386_v10, %v2385_v7  ;;  %p3152_p12 = pnand %p3151_p11, %p3310_p5  ;;  %p3159_p2 = por %p3158_p1, %p3157_p0 }
 0x382   : > { %p3153_p13 = pneg %p3152_p12 }
 0x383   : > { %3003 = vmatpush3.bf16.msra.mxu1 %v3002_v25  ;;  %v3058_v25 = vpack.c.bf16 %v2370_v21, %v2369_v22 }
 0x384   : > { %3037 = vmatprep.subr.bf16.mxu1 %v3036_v3  ;;  %v3060_v3 = vpack.c.bf16 %v2388_v24, %v2387_v16  ;;  %p3160_p3 = pnand %p3159_p2, %p3153_p13 }
 0x386   : > { %1647 = vmatmul.mubr.f32.vlgmr.msra.gmra.mrb[20].mxu1 %v3135_v55  ;;  %v3144_v55 = vld [vmem:[%s4192_s3 + $0x80] sm:$0xff] }
 0x387   : > { %3039 = vmatpush3.bf16.msra.mxu1 %v3038_v45  ;;  %1651 = vmatprep.mubr.f32.mxu1 %v3136_v41  ;;  %v3062_v45 = vpack.c.bf16 %v2372_v38, %v2371_v36  ;;  %v3146_v41 = vld [vmem:[%s4192_s3 + $0xc8] sm:$0xff] }
 0x388   : > { %3041 = vmatprep.subr.bf16.mxu1 %v3040_v62  ;;  %v3064_v62 = vpack.c.bf16 %v2390_v26, %v2389_v60 }
 0x38a   : > { %1652 = vmatmul.mubr.f32.gmra.mrb[22].mxu1 %v3137_v11 }
 0x38b   : > { %3043 = vmatpush3.bf16.msra.mxu1 %v3042_v14  ;;  %1656 = vmatprep.mubr.f32.mxu1 %v3138_v53  ;;  %v3145_v14 = vld [vmem:[%s4192_s3 + $0x78] sm:$0xff] }
 0x38c   : > { %3045 = vmatprep.subr.bf16.mxu1 %v3044_v33  ;;  %v3147_v33 = vld [vmem:[%s4192_s3 + $0xc0] sm:$0xff] }
 0x38e   : > { %1657 = vmatmul.mubr.f32.gmra.mrb[24].mxu1 %v3139_v50 }
 0x38f   : > { %3047 = vmatpush3.bf16.msra.mxu1 %v3046_v18  ;;  %1661 = vmatprep.mubr.f32.mxu1 %v3140_v56 }
 0x390   : > { %3049 = vmatprep.subr.bf16.mxu1 %v3048_v17 }
 0x392   : > { %1662 = vmatmul.mubr.f32.gmra.mrb[26].mxu1 %v3141_v12 }
 0x393   : > { %3051 = vmatpush3.bf16.msra.mxu1 %v3050_v52  ;;  %1816 = vmatprep.mubr.f32.mxu1 %v3142_v32 }
 0x394   : > { %3053 = vmatprep.subr.bf16.mxu1 %v3052_v58 }
 0x397   : > { %3055 = vmatpush3.bf16.msra.mxu1 %v3054_v9 }
 0x398   : > { %3057 = vmatprep.subr.bf16.mxu1 %v3056_v27 }
 0x39b   : > { %3059 = vmatpush3.bf16.msra.mxu1 %v3058_v25 }
 0x39c   : > { %3061 = vmatprep.subr.bf16.mxu1 %v3060_v3 }
 0x39f   : > { %3063 = vmatpush3.bf16.msra.mxu1 %v3062_v45 }
 0x3a0   : > { %3065 = vmatprep.subr.bf16.mxu1 %v3064_v62 }
 0x3a3   : > { %3067 = vmatpush3.bf16.msra.mxu1 %v3066_v42 }
 0x3a4   : > { %2802 = vmatprep.subr.mxu1 %v3217_v28 }
 0x3a6   : > { %1817 = vmatmul.mubr.f32.vlgmr.msra.gmra.mrb[28].mxu1 %v3143_v54 }
 0x3a7   : > { %1821 = vmatprep.mubr.f32.mxu1 %v3144_v55 }
 0x3aa   : > { %1822 = vmatmul.mubr.f32.gmra.mrb[30].mxu1 %v3145_v14 }
 0x3ab   : > { %1826 = vmatprep.mubr.f32.mxu1 %v3146_v41 }
 0x3ae   : > { %1827 = vmatmul.mubr.f32.gmra.mrb[32].mxu1 %v3147_v33 }
 0x3af   : > { %1831 = vmatprep.mubr.f32.mxu1 %v3148_v15 }
 0x3b2   : > { %1832 = vmatmul.mubr.f32.gmra.mrb[34].mxu1 %v3149_v34 }
 0x3b3   : > { %2804 = vmatprep.mubr.msk.f32.mxu1 %vm3218_vm2, %v3217_v28 }
 0x3b8   : > { %v2623_v59 = vpop.f32.mrb[20].mxu0 }
 0x3b9   : > { %v2624_v4 = vpop.f32.mrb[21].mxu0 }
 0x3ba   : > { %v2625_v11 = vadd.f32 %v2624_v4, %v2623_v59 }
 0x3bc   : > { %v2626_v18 = vpop.f32.mrb[22].mxu0 }
 0x3bd   : > { %v2627_v53 = vpop.f32.mrb[23].mxu0 }
 0x3be   : > { %v2628_v17 = vadd.f32 %v2627_v53, %v2626_v18 }
 0x3c0   : > { %v2629_v20 = vpop.f32.mrb[24].mxu0 }
 0x3c1   : > { %v2630_v6 = vpop.f32.mrb[25].mxu0 }
 0x3c2   : > { %v2631_v8 = vadd.f32 %v2630_v6, %v2629_v20  ;;  %v1976_v6 = vpop.xlane.xlu0 %1975 }
 0x3c4   : > { %v2632_v47 = vpop.f32.mrb[26].mxu0 }
 0x3c5   : > { %v2633_v50 = vpop.f32.mrb[27].mxu0 }
 0x3c6   : > { %v2634_v52 = vadd.f32 %v2633_v50, %v2632_v47  ;;  %v1977_v47 = vmul.f32 0.0078125, %v1976_v6 }
 0x3c8   : > { %v1978_v50 = vadd.f32 1e-05, %v1977_v47 }
 0x3ca   : > { %3130 = vrsqrt.f32 %v1978_v50 }
 0x3d8   : > { %v2711_v56 = vpop.f32.mrb[28].mxu0 }
 0x3d9   : > { %v2712_v58 = vpop.f32.mrb[29].mxu0 }
 0x3da   : > { %v2713_v1 = vadd.f32 %v2712_v58, %v2711_v56 }
 0x3dc   : > { %v2714_v5 = vpop.f32.mrb[30].mxu0 }
 0x3dd   : > { %v2715_v7 = vpop.f32.mrb[31].mxu0 }
 0x3de   : > { %v2716_v10 = vadd.f32 %v2715_v7, %v2714_v5 }
 0x3e0   : > { %v2717_v12 = vpop.f32.mrb[32].mxu0 }
 0x3e1   : > { %v2718_v28 = vpop.f32.mrb[33].mxu0 }
 0x3e2   : > { %v2719_v9 = vadd.f32 %v2718_v28, %v2717_v12  ;;  %v1958_v28 = vmul.f32 %v3795_v31, %v3777_v2 }
 0x3e4   : > { %v2720_v32 = vpop.f32.mrb[34].mxu0 }
 0x3e5   : > { %v2721_v27 = vpop.f32.mrb[35].mxu0 }
 0x3e6   : > { %v2722_v22 = vadd.f32 %v2721_v27, %v2720_v32 }
 0x3e8   : > { %v2798_v21 = vpop.f32.mrb[36].mxu0 }
 0x3e9   : > { %v1903_v16 = vpop.f32.mrb[37].mxu0 }
 0x3ec   : > { %v2801_v24 = vpop.f32.mrb[38].mxu0 }
 0x3ed   : > { %v1913_v25 = vpop.f32.mrb[39].mxu0 }
 0x439   : > { %v4108_v3 = vpop.f32.mrb[18].mxu1 }
 0x43a   : > { %v2793_v36 = vpop.f32.mrb[19].mxu1 }
 0x459   : > { %v2667_v38 = vpop.f32.mrb[20].mxu1 }
 0x45a   : > { %v2668_v60 = vpop.f32.mrb[21].mxu1 }
 0x45b   : > { %v2669_v26 = vadd.f32 %v2668_v60, %v2667_v38 }
 0x45d   : > { %v1649_v45 = vadd.f32 %v2669_v26, %v2625_v11  ;;  %v2670_v62 = vpop.f32.mrb[22].mxu1  ;;  %v3131_v26 = vpop.eup %3130 }
 0x45e   : > { %v2671_v40 = vpop.f32.mrb[23].mxu1 }
 0x45f   : > { %v1734_v46 = vadd.f32 %v2713_v1, %v1649_v45  ;;  %v2672_v42 = vadd.f32 %v2671_v40, %v2670_v62 }
 0x461   : > { %v1654_v54 = vadd.f32 %v2672_v42, %v2628_v17  ;;  %v2673_v55 = vpop.f32.mrb[24].mxu1 }
 0x462   : > { %v2674_v14 = vpop.f32.mrb[25].mxu1 }
 0x463   : > { %v1739_v41 = vadd.f32 %v2716_v10, %v1654_v54  ;;  %v2675_v33 = vadd.f32 %v2674_v14, %v2673_v55 }
 0x465   : > { %v1659_v15 = vadd.f32 %v2675_v33, %v2631_v8  ;;  %v2676_v34 = vpop.f32.mrb[26].mxu1 }
 0x466   : > { %v2677_v59 = vpop.f32.mrb[27].mxu1 }
 0x467   : > { %v1744_v4 = vadd.f32 %v2719_v9, %v1659_v15  ;;  %v2678_v18 = vadd.f32 %v2677_v59, %v2676_v34 }
 0x469   : > { %v1664_v53 = vadd.f32 %v2678_v18, %v2634_v52 }
 0x46b   : > { %v1749_v20 = vadd.f32 %v2722_v22, %v1664_v53 }
 0x479   : > { %v2755_v11 = vpop.f32.mrb[28].mxu1 }
 0x47a   : > { %v2756_v56 = vpop.f32.mrb[29].mxu1 }
 0x47b   : > { %v2757_v58 = vadd.f32 %v2756_v56, %v2755_v11 }
 0x47d   : > { %v2758_v1 = vpop.f32.mrb[30].mxu1  ;;  %v1819_v17 = vadd.f32 %v2757_v58, %v1734_v46  ;;  %v1980_v46 = vmul.f32 %v3131_v26, %v3956_v23 }
 0x47e   : > { %v2759_v5 = vpop.f32.mrb[31].mxu1 }
 0x47f   : > { %v2760_v7 = vadd.f32 %v2759_v5, %v2758_v1  ;;  %v1904_v10 = vadd.f32 %v1903_v16, %v1819_v17 }
 0x481   : > { %v1824_v12 = vadd.f32 %v2760_v7, %v1739_v41  ;;  %v1954_v8 = vmul.f32 %v1904_v10, %v3773_v51  ;;  %v2761_v52 = vpop.f32.mrb[32].mxu1  ;;  %v1960_v51 = vmul.f32 %v3867_v13, %v3869_v48 }
 0x482   : > { %v2762_v9 = vpop.f32.mrb[33].mxu1 }
 0x483   : > { %v1909_v32 = vadd.f32 %v2798_v21, %v1824_v12  ;;  %v1962_v27 = vadd.f32 %v1958_v28, %v1954_v8  ;;  %v2763_v22 = vadd.f32 %v2762_v9, %v2761_v52 }
 0x485   : > { %v1955_v36 = vmul.f32 %v1909_v32, %v3750_v37  ;;  %v2764_v38 = vpop.f32.mrb[34].mxu1  ;;  %v1829_v60 = vadd.f32 %v2763_v22, %v1744_v4  ;;  %v1966_v37 = vadd.f32 %v1962_v27, %v3803_v49  ;;  %v2253_v49 = vld [vmem:[%s4197_s8 + $0x8] sm:$0xff] }
 0x486   : > { %v2765_v45 = vpop.f32.mrb[35].mxu1 }
 0x487   : > { %v1963_v62 = vadd.f32 %v3755_v44, %v1955_v36  ;;  %v2766_v16 = vadd.f32 %v2765_v45, %v2764_v38  ;;  %v1914_v40 = vadd.f32 %v1913_v25, %v1829_v60 }
 0x489   : > { %v1967_v2 = vadd.f32 %v1963_v62, %v3791_v29  ;;  %v1834_v31 = vadd.f32 %v2766_v16, %v1749_v20  ;;  %v1956_v21 = vmul.f32 %v1914_v40, %v3885_v35 }
 0x48b   : > { %v1919_v42 = vadd.f32 %v2801_v24, %v1834_v31  ;;  %v1964_v54 = vadd.f32 %v1960_v51, %v1956_v21  ;;  %v1981_v55 = vmul.f32 %v1980_v46, %v1967_v2 }
 0x48d   : > { %v1957_v44 = vmul.f32 %v1919_v42, %v3863_v43  ;;  %v1982_v14 = vadd.f32 %v1981_v55, %v1966_v37  ;;  %v1968_v53 = vadd.f32 %v1964_v54, %v3979_v61 }
 0x48f   : > { %v1965_v25 = vadd.f32 %v3875_v57, %v1957_v44  ;;  %v1983_v13 = vmax.f32 %v1982_v14, 0.0 }
 0x491   : > { %2803 = vmatpush3.msra.mxu1 %v1983_v13  ;;  %v1969_v4 = vadd.f32 %v1965_v25, %v3951_v39 }
 0x492   : > { %2805 = vmatmul.mubr.msk.f32.vlgmr.msra.gmra.mrb[36].mxu1 %vm1192_vm3, %v3809_v30 }
 0x565   : > { %v2050_v29 = vpop.f32.mrb[36].mxu1 }
 0x566   : > { %v2051_v48 = vadd.f32 %v2050_v29, %v3819_v63  ;;  %v2806_v35 = vpop.f32.mrb[37].mxu1 }
 0x568   : > { %2054 = vadd.xlane.f32.xlu0 %v2051_v48 }
 0x57e   : > { %1282 = vperm.xlu0 %3123, %v2253_v49  }
 0x5f5   : > { %v2055_v43 = vpop.xlane.xlu0 %2054 }
 0x5f6   : > { %v2056_v23 = vmul.f32 0.0078125, %v2055_v43 }
 0x5f8   : > { %v2057_v24 = vsub.f32 %v2051_v48, %v2056_v23 }
 0x5fa   : > { %v2058_v57 = vmul.f32 %v2057_v24, %v2057_v24 }
 0x5fc   : > { %2059 = vadd.xlane.f32.xlu1 %v2058_v57 }
 0x5fd   : > { %v1283_v41 = vpop.permute.xlu0 %1282 }
 0x5fe   : > { %v1355_v30 = vadd.f32 %v4108_v3, %v1283_v41 }
 0x600   : > { %v1358_v63 = vadd.f32 %v1355_v30, %v3822_v0 }
 0x602   : > { %1359 = vst [vmem:[%s360_s27] sm:$0xff] %v1358_v63 }
 0x689   : > { %v2060_v33 = vpop.xlane.xlu1 %2059 }
 0x68a   : > { %v2061_v15 = vmul.f32 0.0078125, %v2060_v33 }
 0x68c   : > { %v2062_v34 = vadd.f32 1e-05, %v2061_v15 }
 0x68e   : > { %3132 = vrsqrt.f32 %v2062_v34 }
 0x698   : > { %v3133_v59 = vpop.eup %3132 }
 0x699   : > { %v2064_v18 = vmul.f32 %v3133_v59, %v2057_v24 }
 0x69b   : > { %v2065_v20 = vmul.f32 %v2064_v18, %v1969_v4 }
 0x69d   : > { %v2066_v6 = vadd.f32 %v2065_v20, %v1968_v53 }
 0x69f   : > { %v2067_v3 = vmax.f32 %v2066_v6, 0.0 }
 0x6a1   : > { %2808 = vmatpush3.msra.mxu0 %v2067_v3 }
 0x6a2   : > { %2810 = vmatmul.mubr.msk.f32.vlgmr.msra.gmra.mrb[40].mxu0 %vm1192_vm3, %v3995_v19 }
 0x775   : > { %v2134_v0 = vpop.f32.mrb[40].mxu0 }
 0x776   : > { %v2135_v47 = vadd.f32 %v2134_v0, %v1283_v41  ;;  %v2811_v50 = vpop.f32.mrb[41].mxu0 }
 0x778   : > { %v2138_v39 = vadd.f32 %v2135_v47, %v2051_v48 }
 0x77a   : > { %2399 = vst [vmem:[%s360_s27 + $0x8] sm:$0xff] %v2138_v39 }
 0x77b   : > { %3163 = shalt.err (!%p3160_p3)
}
 0x77c   : > { %s3164_s29 = scalar_lea.hbm %s4144_s14, 256  ;;  %s3168_s27 = scalar_lea.hbm %s4198_s9, 512 }
 0x77d   : > { %p3165_p4 = scmp.ne.s32.totalorder %s4144_s14, %s3164_s29  ;;  %p3169_p9 = scmp.lt.u32.totalorder %s4144_s14, %s4198_s9 }
 0x77e   : > { %p3170_p10 = scmp.lt.u32.totalorder %s3168_s27, %s3164_s29  ;;  %p3172_p12 = scmp.lt.u32.totalorder %s3164_s29, %s4144_s14 }
 0x77f   : > { %p3166_p7 = pnand %p3165_p4, %p3310_p5 }
 0x780   : > { %p3171_p11 = por %p3170_p10, %p3169_p9 }
 0x781   : > { %p3167_p8 = pneg %p3166_p7 }
 0x782   : > { %p3173_p13 = por %p3172_p12, %p3171_p11 }
 0x784   : > { %p3174_p0 = pnand %p3173_p13, %p3167_p8 }
 0x786   : > { %3177 = shalt.err (!%p3174_p0)
}
 0x787   : > { %s3220_s23 = smov 128   ;;  %s3221_s21 = smov 8  }
 0x788   : > { %3069 = dma.vmem_to_hbm [thread:$0]  (%p3310_p5), %s4139_s22, 256, %s4144_s14, %s4148_s16, %s3220_s23, %s3220_s23, %s3221_s21  }
 0x789 PF: > { %p3075_p1 = scmp.ge.s32.totalorder %s3212_s12, 2  ;;  %s2170_s13 = sand.u32 1, %s3200_s30  }
 0x78a   : > { %s2171_s17 = scalar_lea.sflag [#allocation3], %s2170_s13 }
 0x78b   : > { %p3072_p2 = pnand %p3075_p1, %p3314_p6 }
 0x78d   : > { %3195 = dma.done.wait (!%p3072_p2), %s2171_s17, 256  }
 0x78e   : > { %3197 = vsyncadd (!%p3072_p2), %s2171_s17, 4294967040  ;;  %p19_p3 = scmp.ge.s32.totalorder %s3297_s15, 4   ;;  %s4208_s30 = smov %s3204_s10 }
 0x78f   : > { %s4209_s10 = smov %s3208_s11  ;;  %s4210_s11 = smov %s3308_s18 }
 0x790   : > { %s4211_s12 = smov %s3297_s15  ;;  %21 = sbr.rel (!%p19_p3) target bundleno = 5 (0x5), region = 103 }
 0x797   :  { %2176 = vsyncpa [#allocation3], 1 }
 0x798   :  { %2178 = vsyncpa [#allocation3 + $0x1], 1 }

</bundles_post_ra>
